<compile_context>
chip_gen: v6e
topology: v6e:2x2x1
jax: 0.10.0
libtpu: 0.0.40
codegen_flags: <defaults>
</compile_context>

<pallas_src>
import math
from functools import partial

import jax
import jax.numpy as jnp
from jax.experimental import pallas as pl
from jax.experimental.pallas import tpu as pltpu


def _silu(x):
    return x * jax.nn.sigmoid(x)


def _softplus(x):
    # numerically stable softplus (== torch.nn.functional.softplus)
    return jnp.maximum(x, 0.0) + jnp.log1p(jnp.exp(-jnp.abs(x)))


def mamba_block_kernel(
    # inputs
    x_ref,
    ln_w_ref, ln_b_ref, w_in_ref, conv_w_ref, conv_b_ref,
    wx_ref, w_dt_ref, b_dt_ref, a_T_ref, skip_d_ref, w_out_ref,
    # outputs
    out_ref,
    # scratch
    h_sc, xp_prev_sc, da_sc, dbu_sc, c_sc, y_sc,
    *, eps, dt_rank, unroll,
):
    c_idx = pl.program_id(1)                      # chunk index along the sequence
    Lc = x_ref.shape[1]
    d_conv, d_inner = conv_w_ref.shape
    d_state = a_T_ref.shape[0]
    bf16 = jnp.bfloat16

    # ---- reset per-sequence carries at the first chunk of every batch row ----
    @pl.when(c_idx == 0)
    def _():
        h_sc[...] = jnp.zeros_like(h_sc)
        xp_prev_sc[...] = jnp.zeros_like(xp_prev_sc)

    x = x_ref[0].astype(jnp.float32)              # (Lc, d_model)

    # ---- Block.norm: LayerNorm over the channel dim ----
    mu = jnp.mean(x, axis=-1, keepdims=True)
    var = jnp.mean((x - mu) ** 2, axis=-1, keepdims=True)
    xn = (x - mu) * jax.lax.rsqrt(var + eps) * ln_w_ref[...] + ln_b_ref[...]

    # ---- in_proj: (Lc, d_model) @ (d_model, 2*d_inner), bf16 operands / f32 accum ----
    xz = jnp.dot(xn.astype(bf16), w_in_ref[...], preferred_element_type=jnp.float32)
    xp = xz[:, :d_inner]                          # conv branch (f32)
    z = xz[:, d_inner:]                           # gate branch (f32)

    # ---- causal depthwise conv1d + SiLU (cross-chunk tail carried in xp_prev_sc) ----
    xp_prev = xp_prev_sc[...]                     # previous chunk's conv input (zeros at c==0)
    row = jax.lax.broadcasted_iota(jnp.int32, (Lc, 1), 0)
    acc = conv_w_ref[d_conv - 1:d_conv, :] * xp   # j = 0 term: w[K-1] * x[l]
    for j in range(1, d_conv):
        cur = pltpu.roll(xp, shift=j, axis=0)         # x[l - j] for l >= j
        prev = pltpu.roll(xp_prev, shift=j, axis=0)   # previous chunk tail for l < j
        shifted = jnp.where(row >= j, cur, prev)
        acc = acc + conv_w_ref[d_conv - 1 - j:d_conv - j, :] * shifted
    xp_prev_sc[...] = xp                          # update carry for the next chunk
    xc = _silu(acc + conv_b_ref[...])             # (Lc, d_inner) f32

    # ---- fused x_proj: one matmul producing [dt_low | B | C] ----
    xproj = jnp.dot(xc.astype(bf16), wx_ref[...], preferred_element_type=jnp.float32)
    dt_low = xproj[:, :dt_rank]                                   # (Lc, dt_rank)
    bmat = xproj[:, dt_rank:dt_rank + d_state]                    # (Lc, d_state)
    cmat = xproj[:, dt_rank + d_state:dt_rank + 2 * d_state]      # (Lc, d_state)

    # ---- dt_proj + softplus ----
    dt = jnp.dot(dt_low.astype(bf16), w_dt_ref[...],
                 preferred_element_type=jnp.float32) + b_dt_ref[...]
    delta = _softplus(dt)                         # (Lc, d_inner) f32

    # ---- discretize (A = -exp(A_log) precomputed on host, stored (d_state, d_inner)) ----
    a_T = a_T_ref[...]
    da_sc[...] = jnp.exp(delta[:, None, :] * a_T[None, :, :])     # (Lc, d_state, d_inner)
    dbu_sc[...] = bmat[:, :, None] * (delta * xc)[:, None, :]     # (Lc, d_state, d_inner)
    c_sc[...] = cmat

    # ---- selective scan: U timesteps per iteration, y accumulated inside the loop ----
    @pl.loop(0, Lc // unroll)
    def _(i):
        base = pl.multiple_of(i * unroll, unroll)
        da_u = da_sc[pl.ds(base, unroll)]         # (U, d_state, d_inner)
        dbu_u = dbu_sc[pl.ds(base, unroll)]
        cs = c_sc[pl.ds(base, unroll)]            # (U, d_state)
        h = h_sc[...]
        hs = []
        for u in range(unroll):                   # statically unrolled recurrence
            h = da_u[u] * h + dbu_u[u]
            hs.append(h)
        h_sc[...] = h
        h_stack = jnp.stack(hs, axis=0)           # (U, d_state, d_inner)
        y_sc[pl.ds(base, unroll)] = jnp.sum(h_stack * cs[:, :, None], axis=1)

    # ---- skip, gate, out_proj ----
    y = y_sc[...] + skip_d_ref[...] * xc
    y = y * _silu(z)
    out_ref[0] = jnp.dot(y.astype(bf16), w_out_ref[...],
                         preferred_element_type=jnp.float32).astype(out_ref.dtype)


_PARAM_ORDER = ("ln_w", "ln_b", "w_in", "conv_w", "conv_b", "wx", "w_dt", "b_dt",
                "A_T", "D", "w_out")


def mamba_block_apply(x, params, *, eps=1e-5, chunk_len=256, scan_unroll=8):
    B, L, d_model = x.shape
    d_inner = params["D"].shape[1]
    d_state = params["A_T"].shape[0]
    dt_rank = params["w_dt"].shape[0]

    lc = min(chunk_len, L)
    assert L % lc == 0, "sequence length must be divisible by the chunk length"
    u = scan_unroll
    while lc % u:
        u //= 2

    plist = [params[k] for k in _PARAM_ORDER]

    grid_spec = pltpu.PrefetchScalarGridSpec(
        num_scalar_prefetch=0,
        grid=(B, L // lc),                               # (batch, sequence chunk)
        in_specs=[pl.BlockSpec((1, lc, d_model), lambda b, c: (b, c, 0))]
        + [pl.BlockSpec(w.shape, lambda b, c: (0, 0)) for w in plist],  # params are all 2D
        out_specs=pl.BlockSpec((1, lc, d_model), lambda b, c: (b, c, 0)),
        scratch_shapes=[
            pltpu.VMEM((d_state, d_inner), jnp.float32),      # SSM state carry h
            pltpu.VMEM((lc, d_inner), jnp.float32),           # previous-chunk conv input
            pltpu.VMEM((lc, d_state, d_inner), jnp.float32),  # exp(delta*A)
            pltpu.VMEM((lc, d_state, d_inner), jnp.float32),  # delta*B*u
            pltpu.VMEM((lc, d_state), jnp.float32),           # C
            pltpu.VMEM((lc, d_inner), jnp.float32),           # per-step y
        ],
    )
    return pl.pallas_call(
        partial(mamba_block_kernel, eps=eps, dt_rank=dt_rank, unroll=u),
        out_shape=jax.ShapeDtypeStruct((B, L, d_model), x.dtype),
        grid_spec=grid_spec,
        input_output_aliases={0: 0},                     # write back into the activation buffer
        compiler_params=pltpu.CompilerParams(
            dimension_semantics=("parallel", "arbitrary"),
            vmem_limit_bytes=48 * 1024 * 1024,
        ),
    )(x, *plist)


def init_block_params(key, d_model, d_state=16, d_conv=4, expand=2):
    """Deterministic synthetic params. Shapes follow mamba_ssm.Mamba defaults.
    Linear weights stored transposed (in, out); x_proj fused as [dt | B | C];
    A stored as -exp(A_log) transposed to (d_state, d_inner); matmul weights in bf16."""
    d_inner = expand * d_model
    dt_rank = math.ceil(d_model / 16)
    ks = jax.random.split(key, 5)
    s = 0.05
    f32, bf16 = jnp.float32, jnp.bfloat16
    # Mamba S4D-real init: A_log[d, n] = log(n + 1)
    a_log = jnp.log(jnp.tile(jnp.arange(1, d_state + 1, dtype=f32)[None, :], (d_inner, 1)))
    return {
        "ln_w": jnp.ones((1, d_model), f32),
        "ln_b": jnp.zeros((1, d_model), f32),
        "w_in": (jax.random.normal(ks[0], (d_model, 2 * d_inner), f32) * s).astype(bf16),
        "conv_w": jax.random.normal(ks[1], (d_conv, d_inner), f32) * s,
        "conv_b": jnp.zeros((1, d_inner), f32),
        "wx": (jax.random.normal(ks[2], (d_inner, dt_rank + 2 * d_state), f32) * s).astype(bf16),
        "w_dt": (jax.random.normal(ks[3], (dt_rank, d_inner), f32) * s).astype(bf16),
        "b_dt": jnp.full((1, d_inner), 0.1, f32),
        "A_T": (-jnp.exp(a_log)).T,                      # (d_state, d_inner), f32
        "D": jnp.ones((1, d_inner), f32),
        "w_out": (jax.random.normal(ks[4], (d_inner, d_model), f32) * s).astype(bf16),
    }


def basic_layer_forward(x, x_size, block_params, eps=1e-5, chunk_len=256):
    """BasicLayer.forward: iterate blocks; residual output dropped; downsample is always None."""
    del x_size  # only a non-None residual placeholder in the PyTorch code
    for p in block_params:
        x = mamba_block_apply(x, p, eps=eps, chunk_len=chunk_len)
    return x


# ------------------------- pure-JAX reference (f32) -------------------------
def mamba_block_ref(x, params, eps=1e-5):
    f32 = jnp.float32
    d_inner = params["D"].shape[1]
    d_state = params["A_T"].shape[0]
    dt_rank = params["w_dt"].shape[0]
    d_conv = params["conv_w"].shape[0]
    B, L, _ = x.shape
    w_in = params["w_in"].astype(f32)
    wx = params["wx"].astype(f32)
    w_dt = params["w_dt"].astype(f32)
    w_out = params["w_out"].astype(f32)

    mu = jnp.mean(x, -1, keepdims=True)
    var = jnp.mean((x - mu) ** 2, -1, keepdims=True)
    xn = (x - mu) * jax.lax.rsqrt(var + eps) * params["ln_w"][0] + params["ln_b"][0]
    xz = xn @ w_in
    xp, z = xz[..., :d_inner], xz[..., d_inner:]
    xpad = jnp.pad(xp, ((0, 0), (d_conv - 1, 0), (0, 0)))
    xc = sum(params["conv_w"][k] * xpad[:, k:k + L, :] for k in range(d_conv)) + params["conv_b"][0]
    xc = _silu(xc)
    xproj = xc @ wx
    dt_low = xproj[..., :dt_rank]
    bmat = xproj[..., dt_rank:dt_rank + d_state]
    cmat = xproj[..., dt_rank + d_state:dt_rank + 2 * d_state]
    delta = _softplus(dt_low @ w_dt + params["b_dt"][0])
    a_T = params["A_T"]
    da = jnp.exp(delta[..., None, :] * a_T)                       # (B, L, d_state, d_inner)
    dbu = bmat[..., :, None] * (delta * xc)[..., None, :]

    def scan_one(da_b, dbu_b, c_b):
        def step(h, inp):
            da_t, dbu_t, c_t = inp
            h = da_t * h + dbu_t
            return h, jnp.sum(h * c_t[:, None], axis=0)
        h0 = jnp.zeros((d_state, d_inner), f32)
        _, ys = jax.lax.scan(step, h0, (da_b, dbu_b, c_b))
        return ys

    y = jax.vmap(scan_one)(da, dbu, cmat)                         # (B, L, d_inner)
    y = (y + params["D"][0] * xc) * _silu(z)
    return y @ w_out


def basic_layer_forward_ref(x, block_params, eps=1e-5):
    for p in block_params:
        x = mamba_block_ref(x, p, eps=eps)
    return x
# -----------------------------------------------------------------------------


if __name__ == "__main__":
    key = jax.random.PRNGKey(0)
    B, H, W, dim, depth = 2, 8, 8, 32, 2
    L = H * W
    kx, kp = jax.random.split(key)
    x = jax.random.normal(kx, (B, L, dim), jnp.float32)
    block_params = [init_block_params(k, dim) for k in jax.random.split(kp, depth)]

    # chunk_len=32 -> 2 sequence chunks per batch row: exercises the cross-chunk carries.
    fwd = jax.jit(lambda xx, ps: basic_layer_forward(xx, (H, W), ps, chunk_len=32))
    y = jax.block_until_ready(fwd(x, block_params))

    y_ref = basic_layer_forward_ref(x, block_params)
    err = float(jnp.max(jnp.abs(y - y_ref)))

    assert y.shape == (B, L, dim)
    assert bool(jnp.all(jnp.isfinite(y)))
    assert err < 5e-2, f"max abs err vs reference: {err}"
    print("KERNEL_OK")
</pallas_src>

<mosaic_0001>
module attributes {stable_mosaic.version = 11 : i64} {
  func.func @mamba_block_kernel(%arg0: i32, %arg1: i32, %arg2: memref<1x32x32xf32, #tpu.memory_space<vmem>>, %arg3: memref<1x32xf32, #tpu.memory_space<vmem>>, %arg4: memref<1x32xf32, #tpu.memory_space<vmem>>, %arg5: memref<32x128xbf16, #tpu.memory_space<vmem>>, %arg6: memref<4x64xf32, #tpu.memory_space<vmem>>, %arg7: memref<1x64xf32, #tpu.memory_space<vmem>>, %arg8: memref<64x34xbf16, #tpu.memory_space<vmem>>, %arg9: memref<2x64xbf16, #tpu.memory_space<vmem>>, %arg10: memref<1x64xf32, #tpu.memory_space<vmem>>, %arg11: memref<16x64xf32, #tpu.memory_space<vmem>>, %arg12: memref<1x64xf32, #tpu.memory_space<vmem>>, %arg13: memref<64x32xbf16, #tpu.memory_space<vmem>>, %arg14: memref<1x32x32xf32, #tpu.memory_space<vmem>>, %arg15: memref<16x64xf32, #tpu.memory_space<vmem>>, %arg16: memref<32x64xf32, #tpu.memory_space<vmem>>, %arg17: memref<32x16x64xf32, #tpu.memory_space<vmem>>, %arg18: memref<32x16x64xf32, #tpu.memory_space<vmem>>, %arg19: memref<32x16xf32, #tpu.memory_space<vmem>>, %arg20: memref<32x64xf32, #tpu.memory_space<vmem>>) attributes {dimension_semantics = [#tpu.dimension_semantics<parallel>, #tpu.dimension_semantics<arbitrary>], iteration_bounds = array<i64: 2, 2>, scalar_prefetch = 0 : i64, scratch_operands = 6 : i64, tpu.core_type = #tpu.core_type<tc>, window_params = [{transform_indices = @transform_0, window_bounds = array<i64: 1, 32, 32>}, {pipeline_mode = #tpu.pipeline_mode<synchronous>, transform_indices = @transform_1, window_bounds = array<i64: 1, 32>}, {pipeline_mode = #tpu.pipeline_mode<synchronous>, transform_indices = @transform_2, window_bounds = array<i64: 1, 32>}, {pipeline_mode = #tpu.pipeline_mode<synchronous>, transform_indices = @transform_3, window_bounds = array<i64: 32, 128>}, {pipeline_mode = #tpu.pipeline_mode<synchronous>, transform_indices = @transform_4, window_bounds = array<i64: 4, 64>}, {pipeline_mode = #tpu.pipeline_mode<synchronous>, transform_indices = @transform_5, window_bounds = array<i64: 1, 64>}, {pipeline_mode = #tpu.pipeline_mode<synchronous>, transform_indices = @transform_6, window_bounds = array<i64: 64, 34>}, {pipeline_mode = #tpu.pipeline_mode<synchronous>, transform_indices = @transform_7, window_bounds = array<i64: 2, 64>}, {pipeline_mode = #tpu.pipeline_mode<synchronous>, transform_indices = @transform_8, window_bounds = array<i64: 1, 64>}, {pipeline_mode = #tpu.pipeline_mode<synchronous>, transform_indices = @transform_9, window_bounds = array<i64: 16, 64>}, {pipeline_mode = #tpu.pipeline_mode<synchronous>, transform_indices = @transform_10, window_bounds = array<i64: 1, 64>}, {pipeline_mode = #tpu.pipeline_mode<synchronous>, transform_indices = @transform_11, window_bounds = array<i64: 64, 32>}, {transform_indices = @transform_12, window_bounds = array<i64: 1, 32, 32>}]} {
    %c0_i32 = arith.constant 0 : i32
    %0 = arith.cmpi eq, %arg1, %c0_i32 : i32
    %1 = arith.extui %0 : i1 to i32
    %c0_i32_0 = arith.constant 0 : i32
    %2 = arith.cmpi ne, %1, %c0_i32_0 : i32
    scf.if %2 {
      %cst_66 = arith.constant 0.000000e+00 : f32
      %137 = vector.broadcast %cst_66 : f32 to vector<16x64xf32>
      %c0_67 = arith.constant 0 : index
      %c0_68 = arith.constant 0 : index
      %138 = vector.load %arg15[%c0_67, %c0_68] : memref<16x64xf32, #tpu.memory_space<vmem>>, vector<16x64xf32>
      tpu.vector_store %arg15[%c0_67, %c0_68], %137 {strides = array<i32>} : memref<16x64xf32, #tpu.memory_space<vmem>>, vector<16x64xf32>,
      %cst_69 = arith.constant 0.000000e+00 : f32
      %139 = vector.broadcast %cst_69 : f32 to vector<32x64xf32>
      %c0_70 = arith.constant 0 : index
      %c0_71 = arith.constant 0 : index
      %140 = vector.load %arg16[%c0_70, %c0_71] : memref<32x64xf32, #tpu.memory_space<vmem>>, vector<32x64xf32>
      tpu.vector_store %arg16[%c0_70, %c0_71], %139 {strides = array<i32>} : memref<32x64xf32, #tpu.memory_space<vmem>>, vector<32x64xf32>,
    } else {
    }
    %c0 = arith.constant 0 : index
    %c0_1 = arith.constant 0 : index
    %c0_2 = arith.constant 0 : index
    %3 = vector.load %arg2[%c0, %c0_1, %c0_2] : memref<1x32x32xf32, #tpu.memory_space<vmem>>, vector<1x32x32xf32>
    %4 = vector.shape_cast %3 : vector<1x32x32xf32> to vector<32x32xf32>
    %cst = arith.constant dense<0.000000e+00> : vector<32xf32>
    %5 = vector.multi_reduction <add>, %4, %cst [1] : vector<32x32xf32> to vector<32xf32>
    %6 = vector.shape_cast %5 : vector<32xf32> to vector<32x1xf32>
    %cst_3 = arith.constant 3.200000e+01 : f32
    %7 = vector.broadcast %cst_3 : f32 to vector<32x1xf32>
    %8 = arith.divf %6, %7 : vector<32x1xf32>
    %9 = vector.broadcast %8 : vector<32x1xf32> to vector<32x32xf32>
    %10 = arith.subf %4, %9 : vector<32x32xf32>
    %11 = arith.mulf %10, %10 : vector<32x32xf32>
    %cst_4 = arith.constant dense<0.000000e+00> : vector<32xf32>
    %12 = vector.multi_reduction <add>, %11, %cst_4 [1] : vector<32x32xf32> to vector<32xf32>
    %13 = vector.shape_cast %12 : vector<32xf32> to vector<32x1xf32>
    %cst_5 = arith.constant 3.200000e+01 : f32
    %14 = vector.broadcast %cst_5 : f32 to vector<32x1xf32>
    %15 = arith.divf %13, %14 : vector<32x1xf32>
    %16 = vector.broadcast %8 : vector<32x1xf32> to vector<32x32xf32>
    %17 = arith.subf %4, %16 : vector<32x32xf32>
    %cst_6 = arith.constant 9.99999974E-6 : f32
    %18 = vector.broadcast %cst_6 : f32 to vector<32x1xf32>
    %19 = arith.addf %15, %18 : vector<32x1xf32>
    %20 = math.rsqrt %19 : vector<32x1xf32>
    %21 = vector.broadcast %20 : vector<32x1xf32> to vector<32x32xf32>
    %22 = arith.mulf %17, %21 : vector<32x32xf32>
    %c0_7 = arith.constant 0 : index
    %c0_8 = arith.constant 0 : index
    %23 = vector.load %arg3[%c0_7, %c0_8] : memref<1x32xf32, #tpu.memory_space<vmem>>, vector<1x32xf32>
    %24 = vector.broadcast %23 : vector<1x32xf32> to vector<32x32xf32>
    %25 = arith.mulf %22, %24 : vector<32x32xf32>
    %c0_9 = arith.constant 0 : index
    %c0_10 = arith.constant 0 : index
    %26 = vector.load %arg4[%c0_9, %c0_10] : memref<1x32xf32, #tpu.memory_space<vmem>>, vector<1x32xf32>
    %27 = vector.broadcast %26 : vector<1x32xf32> to vector<32x32xf32>
    %28 = arith.addf %25, %27 : vector<32x32xf32>
    %29 = arith.truncf %28 : vector<32x32xf32> to vector<32x32xbf16>
    %c0_11 = arith.constant 0 : index
    %c0_12 = arith.constant 0 : index
    %30 = vector.load %arg5[%c0_11, %c0_12] : memref<32x128xbf16, #tpu.memory_space<vmem>>, vector<32x128xbf16>
    %cst_13 = arith.constant dense<0.000000e+00> : vector<32x128xf32>
    %31 = tpu.matmul %29, %30, %cst_13 {dimension_numbers = #tpu.dot_dimension_numbers<[1], [0], [0], [1], [0, 0, 1, 1], [], []>} : vector<32x32xbf16>, vector<32x128xbf16>, vector<32x128xf32> -> vector<32x128xf32>
    %32 = vector.extract_strided_slice %31 {offsets = [0, 0], sizes = [32, 64], strides = [1, 1]} : vector<32x128xf32> to vector<32x64xf32>
    %33 = vector.extract_strided_slice %31 {offsets = [0, 64], sizes = [32, 64], strides = [1, 1]} : vector<32x128xf32> to vector<32x64xf32>
    %c0_14 = arith.constant 0 : index
    %c0_15 = arith.constant 0 : index
    %34 = vector.load %arg16[%c0_14, %c0_15] : memref<32x64xf32, #tpu.memory_space<vmem>>, vector<32x64xf32>
    %35 = tpu.iota {dimensions = array<i32: 0>} : vector<32x1xi32>
    %c3 = arith.constant 3 : index
    %c0_16 = arith.constant 0 : index
    %36 = vector.load %arg6[%c3, %c0_16] : memref<4x64xf32, #tpu.memory_space<vmem>>, vector<1x64xf32>
    %37 = vector.broadcast %36 : vector<1x64xf32> to vector<32x64xf32>
    %38 = arith.mulf %37, %32 : vector<32x64xf32>
    %c1_i32 = arith.constant 1 : i32
    %39 = tpu.dynamic_rotate %32 by %c1_i32 dim 0 : vector<32x64xf32>, i32 -> vector<32x64xf32>
    %c1_i32_17 = arith.constant 1 : i32
    %40 = tpu.dynamic_rotate %34 by %c1_i32_17 dim 0 : vector<32x64xf32>, i32 -> vector<32x64xf32>
    %c1_i32_18 = arith.constant 1 : i32
    %41 = vector.broadcast %c1_i32_18 : i32 to vector<32x1xi32>
    %42 = arith.cmpi sge, %35, %41 : vector<32x1xi32>
    %43 = vector.shape_cast %42 : vector<32x1xi1> to vector<32x1xi1>
    %44 = vector.broadcast %43 : vector<32x1xi1> to vector<32x64xi1>
    %45 = arith.select %44, %39, %40 : vector<32x64xi1>, vector<32x64xf32>
    %c2 = arith.constant 2 : index
    %c0_19 = arith.constant 0 : index
    %46 = vector.load %arg6[%c2, %c0_19] : memref<4x64xf32, #tpu.memory_space<vmem>>, vector<1x64xf32>
    %47 = vector.broadcast %46 : vector<1x64xf32> to vector<32x64xf32>
    %48 = arith.mulf %47, %45 : vector<32x64xf32>
    %49 = arith.addf %38, %48 : vector<32x64xf32>
    %c2_i32 = arith.constant 2 : i32
    %50 = tpu.dynamic_rotate %32 by %c2_i32 dim 0 : vector<32x64xf32>, i32 -> vector<32x64xf32>
    %c2_i32_20 = arith.constant 2 : i32
    %51 = tpu.dynamic_rotate %34 by %c2_i32_20 dim 0 : vector<32x64xf32>, i32 -> vector<32x64xf32>
    %c2_i32_21 = arith.constant 2 : i32
    %52 = vector.broadcast %c2_i32_21 : i32 to vector<32x1xi32>
    %53 = arith.cmpi sge, %35, %52 : vector<32x1xi32>
    %54 = vector.shape_cast %53 : vector<32x1xi1> to vector<32x1xi1>
    %55 = vector.broadcast %54 : vector<32x1xi1> to vector<32x64xi1>
    %56 = arith.select %55, %50, %51 : vector<32x64xi1>, vector<32x64xf32>
    %c1 = arith.constant 1 : index
    %c0_22 = arith.constant 0 : index
    %57 = vector.load %arg6[%c1, %c0_22] : memref<4x64xf32, #tpu.memory_space<vmem>>, vector<1x64xf32>
    %58 = vector.broadcast %57 : vector<1x64xf32> to vector<32x64xf32>
    %59 = arith.mulf %58, %56 : vector<32x64xf32>
    %60 = arith.addf %49, %59 : vector<32x64xf32>
    %c3_i32 = arith.constant 3 : i32
    %61 = tpu.dynamic_rotate %32 by %c3_i32 dim 0 : vector<32x64xf32>, i32 -> vector<32x64xf32>
    %c3_i32_23 = arith.constant 3 : i32
    %62 = tpu.dynamic_rotate %34 by %c3_i32_23 dim 0 : vector<32x64xf32>, i32 -> vector<32x64xf32>
    %c3_i32_24 = arith.constant 3 : i32
    %63 = vector.broadcast %c3_i32_24 : i32 to vector<32x1xi32>
    %64 = arith.cmpi sge, %35, %63 : vector<32x1xi32>
    %65 = vector.shape_cast %64 : vector<32x1xi1> to vector<32x1xi1>
    %66 = vector.broadcast %65 : vector<32x1xi1> to vector<32x64xi1>
    %67 = arith.select %66, %61, %62 : vector<32x64xi1>, vector<32x64xf32>
    %c0_25 = arith.constant 0 : index
    %c0_26 = arith.constant 0 : index
    %68 = vector.load %arg6[%c0_25, %c0_26] : memref<4x64xf32, #tpu.memory_space<vmem>>, vector<1x64xf32>
    %69 = vector.broadcast %68 : vector<1x64xf32> to vector<32x64xf32>
    %70 = arith.mulf %69, %67 : vector<32x64xf32>
    %71 = arith.addf %60, %70 : vector<32x64xf32>
    %c0_27 = arith.constant 0 : index
    %c0_28 = arith.constant 0 : index
    %72 = vector.load %arg16[%c0_27, %c0_28] : memref<32x64xf32, #tpu.memory_space<vmem>>, vector<32x64xf32>
    tpu.vector_store %arg16[%c0_27, %c0_28], %32 {strides = array<i32>} : memref<32x64xf32, #tpu.memory_space<vmem>>, vector<32x64xf32>,
    %c0_29 = arith.constant 0 : index
    %c0_30 = arith.constant 0 : index
    %73 = vector.load %arg7[%c0_29, %c0_30] : memref<1x64xf32, #tpu.memory_space<vmem>>, vector<1x64xf32>
    %74 = vector.broadcast %73 : vector<1x64xf32> to vector<32x64xf32>
    %75 = arith.addf %71, %74 : vector<32x64xf32>
    %76 = arith.negf %75 : vector<32x64xf32>
    %77 = math.exp %76 : vector<32x64xf32>
    %cst_31 = arith.constant 1.000000e+00 : f32
    %78 = vector.broadcast %cst_31 : f32 to vector<32x64xf32>
    %79 = arith.addf %78, %77 : vector<32x64xf32>
    %80 = arith.divf %78, %79 : vector<32x64xf32>
    %81 = arith.mulf %75, %80 : vector<32x64xf32>
    %82 = arith.truncf %81 : vector<32x64xf32> to vector<32x64xbf16>
    %c0_32 = arith.constant 0 : index
    %c0_33 = arith.constant 0 : index
    %83 = vector.load %arg8[%c0_32, %c0_33] : memref<64x34xbf16, #tpu.memory_space<vmem>>, vector<64x34xbf16>
    %cst_34 = arith.constant dense<0.000000e+00> : vector<32x34xf32>
    %84 = tpu.matmul %82, %83, %cst_34 {dimension_numbers = #tpu.dot_dimension_numbers<[1], [0], [0], [1], [0, 0, 1, 1], [], []>} : vector<32x64xbf16>, vector<64x34xbf16>, vector<32x34xf32> -> vector<32x34xf32>
    %85 = vector.extract_strided_slice %84 {offsets = [0, 0], sizes = [32, 2], strides = [1, 1]} : vector<32x34xf32> to vector<32x2xf32>
    %86 = vector.extract_strided_slice %84 {offsets = [0, 2], sizes = [32, 16], strides = [1, 1]} : vector<32x34xf32> to vector<32x16xf32>
    %87 = vector.extract_strided_slice %84 {offsets = [0, 18], sizes = [32, 16], strides = [1, 1]} : vector<32x34xf32> to vector<32x16xf32>
    %88 = arith.truncf %85 : vector<32x2xf32> to vector<32x2xbf16>
    %c0_35 = arith.constant 0 : index
    %c0_36 = arith.constant 0 : index
    %89 = vector.load %arg9[%c0_35, %c0_36] : memref<2x64xbf16, #tpu.memory_space<vmem>>, vector<2x64xbf16>
    %cst_37 = arith.constant dense<0.000000e+00> : vector<32x64xf32>
    %90 = tpu.matmul %88, %89, %cst_37 {dimension_numbers = #tpu.dot_dimension_numbers<[1], [0], [0], [1], [0, 0, 1, 1], [], []>} : vector<32x2xbf16>, vector<2x64xbf16>, vector<32x64xf32> -> vector<32x64xf32>
    %c0_38 = arith.constant 0 : index
    %c0_39 = arith.constant 0 : index
    %91 = vector.load %arg10[%c0_38, %c0_39] : memref<1x64xf32, #tpu.memory_space<vmem>>, vector<1x64xf32>
    %92 = vector.broadcast %91 : vector<1x64xf32> to vector<32x64xf32>
    %93 = arith.addf %90, %92 : vector<32x64xf32>
    %cst_40 = arith.constant 0.000000e+00 : f32
    %94 = vector.broadcast %cst_40 : f32 to vector<32x64xf32>
    %95 = arith.maximumf %93, %94 : vector<32x64xf32>
    %96 = math.absf %93 : vector<32x64xf32>
    %cst_41 = arith.constant 0.000000e+00 : f32
    %97 = vector.broadcast %cst_41 : f32 to vector<32x64xf32>
    %98 = arith.subf %97, %96 : vector<32x64xf32>
    %99 = math.exp %98 : vector<32x64xf32>
    %100 = math.log1p %99 : vector<32x64xf32>
    %101 = arith.addf %95, %100 : vector<32x64xf32>
    %c0_42 = arith.constant 0 : index
    %c0_43 = arith.constant 0 : index
    %102 = vector.load %arg11[%c0_42, %c0_43] : memref<16x64xf32, #tpu.memory_space<vmem>>, vector<16x64xf32>
    %103 = vector.shape_cast %101 : vector<32x64xf32> to vector<32x1x64xf32>
    %104 = vector.shape_cast %102 : vector<16x64xf32> to vector<1x16x64xf32>
    %105 = vector.broadcast %103 : vector<32x1x64xf32> to vector<32x16x64xf32>
    %106 = vector.broadcast %104 : vector<1x16x64xf32> to vector<32x16x64xf32>
    %107 = arith.mulf %105, %106 : vector<32x16x64xf32>
    %108 = math.exp %107 : vector<32x16x64xf32>
    %c0_44 = arith.constant 0 : index
    %c0_45 = arith.constant 0 : index
    %c0_46 = arith.constant 0 : index
    %109 = vector.load %arg17[%c0_44, %c0_45, %c0_46] : memref<32x16x64xf32, #tpu.memory_space<vmem>>, vector<32x16x64xf32>
    tpu.vector_store %arg17[%c0_44, %c0_45, %c0_46], %108 {strides = array<i32>} : memref<32x16x64xf32, #tpu.memory_space<vmem>>, vector<32x16x64xf32>,
    %110 = vector.shape_cast %86 : vector<32x16xf32> to vector<32x16x1xf32>
    %111 = arith.mulf %101, %81 : vector<32x64xf32>
    %112 = vector.shape_cast %111 : vector<32x64xf32> to vector<32x1x64xf32>
    %113 = vector.broadcast %110 : vector<32x16x1xf32> to vector<32x16x64xf32>
    %114 = vector.broadcast %112 : vector<32x1x64xf32> to vector<32x16x64xf32>
    %115 = arith.mulf %113, %114 : vector<32x16x64xf32>
    %c0_47 = arith.constant 0 : index
    %c0_48 = arith.constant 0 : index
    %c0_49 = arith.constant 0 : index
    %116 = vector.load %arg18[%c0_47, %c0_48, %c0_49] : memref<32x16x64xf32, #tpu.memory_space<vmem>>, vector<32x16x64xf32>
    tpu.vector_store %arg18[%c0_47, %c0_48, %c0_49], %115 {strides = array<i32>} : memref<32x16x64xf32, #tpu.memory_space<vmem>>, vector<32x16x64xf32>,
    %c0_50 = arith.constant 0 : index
    %c0_51 = arith.constant 0 : index
    %117 = vector.load %arg19[%c0_50, %c0_51] : memref<32x16xf32, #tpu.memory_space<vmem>>, vector<32x16xf32>
    tpu.vector_store %arg19[%c0_50, %c0_51], %87 {strides = array<i32>} : memref<32x16xf32, #tpu.memory_space<vmem>>, vector<32x16xf32>,
    %c0_i32_52 = arith.constant 0 : i32
    %c4_i32 = arith.constant 4 : i32
    %118 = arith.addi %c0_i32_52, %c4_i32 : i32
    %c1_i32_53 = arith.constant 1 : i32
    scf.for %arg21 = %c0_i32_52 to %118 step %c1_i32_53  : i32 {
      %c1_i32_66 = arith.constant 1 : i32
      %137 = arith.muli %arg21, %c1_i32_66 : i32
      %c0_i32_67 = arith.constant 0 : i32
      %138 = arith.addi %c0_i32_67, %137 : i32
      %c8_i32 = arith.constant 8 : i32
      %139 = arith.muli %138, %c8_i32 : i32
      %140 = tpu.assume_multiple %139, 8 : i32
      %141 = arith.index_cast %140 : i32 to index
      %c0_68 = arith.constant 0 : index
      %c0_69 = arith.constant 0 : index
      %142 = vector.load %arg17[%141, %c0_68, %c0_69] : memref<32x16x64xf32, #tpu.memory_space<vmem>>, vector<8x16x64xf32>
      %143 = arith.index_cast %140 : i32 to index
      %c0_70 = arith.constant 0 : index
      %c0_71 = arith.constant 0 : index
      %144 = vector.load %arg18[%143, %c0_70, %c0_71] : memref<32x16x64xf32, #tpu.memory_space<vmem>>, vector<8x16x64xf32>
      %145 = arith.index_cast %140 : i32 to index
      %c0_72 = arith.constant 0 : index
      %146 = vector.load %arg19[%145, %c0_72] : memref<32x16xf32, #tpu.memory_space<vmem>>, vector<8x16xf32>
      %c0_73 = arith.constant 0 : index
      %c0_74 = arith.constant 0 : index
      %147 = vector.load %arg15[%c0_73, %c0_74] : memref<16x64xf32, #tpu.memory_space<vmem>>, vector<16x64xf32>
      %148 = vector.extract_strided_slice %142 {offsets = [0, 0, 0], sizes = [1, 16, 64], strides = [1, 1, 1]} : vector<8x16x64xf32> to vector<1x16x64xf32>
      %149 = vector.shape_cast %148 : vector<1x16x64xf32> to vector<16x64xf32>
      %150 = arith.mulf %149, %147 : vector<16x64xf32>
      %151 = vector.extract_strided_slice %144 {offsets = [0, 0, 0], sizes = [1, 16, 64], strides = [1, 1, 1]} : vector<8x16x64xf32> to vector<1x16x64xf32>
      %152 = vector.shape_cast %151 : vector<1x16x64xf32> to vector<16x64xf32>
      %153 = arith.addf %150, %152 : vector<16x64xf32>
      %154 = vector.extract_strided_slice %142 {offsets = [1, 0, 0], sizes = [1, 16, 64], strides = [1, 1, 1]} : vector<8x16x64xf32> to vector<1x16x64xf32>
      %155 = vector.shape_cast %154 : vector<1x16x64xf32> to vector<16x64xf32>
      %156 = arith.mulf %155, %153 : vector<16x64xf32>
      %157 = vector.extract_strided_slice %144 {offsets = [1, 0, 0], sizes = [1, 16, 64], strides = [1, 1, 1]} : vector<8x16x64xf32> to vector<1x16x64xf32>
      %158 = vector.shape_cast %157 : vector<1x16x64xf32> to vector<16x64xf32>
      %159 = arith.addf %156, %158 : vector<16x64xf32>
      %160 = vector.extract_strided_slice %142 {offsets = [2, 0, 0], sizes = [1, 16, 64], strides = [1, 1, 1]} : vector<8x16x64xf32> to vector<1x16x64xf32>
      %161 = vector.shape_cast %160 : vector<1x16x64xf32> to vector<16x64xf32>
      %162 = arith.mulf %161, %159 : vector<16x64xf32>
      %163 = vector.extract_strided_slice %144 {offsets = [2, 0, 0], sizes = [1, 16, 64], strides = [1, 1, 1]} : vector<8x16x64xf32> to vector<1x16x64xf32>
      %164 = vector.shape_cast %163 : vector<1x16x64xf32> to vector<16x64xf32>
      %165 = arith.addf %162, %164 : vector<16x64xf32>
      %166 = vector.extract_strided_slice %142 {offsets = [3, 0, 0], sizes = [1, 16, 64], strides = [1, 1, 1]} : vector<8x16x64xf32> to vector<1x16x64xf32>
      %167 = vector.shape_cast %166 : vector<1x16x64xf32> to vector<16x64xf32>
      %168 = arith.mulf %167, %165 : vector<16x64xf32>
      %169 = vector.extract_strided_slice %144 {offsets = [3, 0, 0], sizes = [1, 16, 64], strides = [1, 1, 1]} : vector<8x16x64xf32> to vector<1x16x64xf32>
      %170 = vector.shape_cast %169 : vector<1x16x64xf32> to vector<16x64xf32>
      %171 = arith.addf %168, %170 : vector<16x64xf32>
      %172 = vector.extract_strided_slice %142 {offsets = [4, 0, 0], sizes = [1, 16, 64], strides = [1, 1, 1]} : vector<8x16x64xf32> to vector<1x16x64xf32>
      %173 = vector.shape_cast %172 : vector<1x16x64xf32> to vector<16x64xf32>
      %174 = arith.mulf %173, %171 : vector<16x64xf32>
      %175 = vector.extract_strided_slice %144 {offsets = [4, 0, 0], sizes = [1, 16, 64], strides = [1, 1, 1]} : vector<8x16x64xf32> to vector<1x16x64xf32>
      %176 = vector.shape_cast %175 : vector<1x16x64xf32> to vector<16x64xf32>
      %177 = arith.addf %174, %176 : vector<16x64xf32>
      %178 = vector.extract_strided_slice %142 {offsets = [5, 0, 0], sizes = [1, 16, 64], strides = [1, 1, 1]} : vector<8x16x64xf32> to vector<1x16x64xf32>
      %179 = vector.shape_cast %178 : vector<1x16x64xf32> to vector<16x64xf32>
      %180 = arith.mulf %179, %177 : vector<16x64xf32>
      %181 = vector.extract_strided_slice %144 {offsets = [5, 0, 0], sizes = [1, 16, 64], strides = [1, 1, 1]} : vector<8x16x64xf32> to vector<1x16x64xf32>
      %182 = vector.shape_cast %181 : vector<1x16x64xf32> to vector<16x64xf32>
      %183 = arith.addf %180, %182 : vector<16x64xf32>
      %184 = vector.extract_strided_slice %142 {offsets = [6, 0, 0], sizes = [1, 16, 64], strides = [1, 1, 1]} : vector<8x16x64xf32> to vector<1x16x64xf32>
      %185 = vector.shape_cast %184 : vector<1x16x64xf32> to vector<16x64xf32>
      %186 = arith.mulf %185, %183 : vector<16x64xf32>
      %187 = vector.extract_strided_slice %144 {offsets = [6, 0, 0], sizes = [1, 16, 64], strides = [1, 1, 1]} : vector<8x16x64xf32> to vector<1x16x64xf32>
      %188 = vector.shape_cast %187 : vector<1x16x64xf32> to vector<16x64xf32>
      %189 = arith.addf %186, %188 : vector<16x64xf32>
      %190 = vector.extract_strided_slice %142 {offsets = [7, 0, 0], sizes = [1, 16, 64], strides = [1, 1, 1]} : vector<8x16x64xf32> to vector<1x16x64xf32>
      %191 = vector.shape_cast %190 : vector<1x16x64xf32> to vector<16x64xf32>
      %192 = arith.mulf %191, %189 : vector<16x64xf32>
      %193 = vector.extract_strided_slice %144 {offsets = [7, 0, 0], sizes = [1, 16, 64], strides = [1, 1, 1]} : vector<8x16x64xf32> to vector<1x16x64xf32>
      %194 = vector.shape_cast %193 : vector<1x16x64xf32> to vector<16x64xf32>
      %195 = arith.addf %192, %194 : vector<16x64xf32>
      %c0_75 = arith.constant 0 : index
      %c0_76 = arith.constant 0 : index
      %196 = vector.load %arg15[%c0_75, %c0_76] : memref<16x64xf32, #tpu.memory_space<vmem>>, vector<16x64xf32>
      tpu.vector_store %arg15[%c0_75, %c0_76], %195 {strides = array<i32>} : memref<16x64xf32, #tpu.memory_space<vmem>>, vector<16x64xf32>,
      %197 = vector.shape_cast %153 : vector<16x64xf32> to vector<1x16x64xf32>
      %198 = vector.shape_cast %159 : vector<16x64xf32> to vector<1x16x64xf32>
      %199 = vector.shape_cast %165 : vector<16x64xf32> to vector<1x16x64xf32>
      %200 = vector.shape_cast %171 : vector<16x64xf32> to vector<1x16x64xf32>
      %201 = vector.shape_cast %177 : vector<16x64xf32> to vector<1x16x64xf32>
      %202 = vector.shape_cast %183 : vector<16x64xf32> to vector<1x16x64xf32>
      %203 = vector.shape_cast %189 : vector<16x64xf32> to vector<1x16x64xf32>
      %204 = vector.shape_cast %195 : vector<16x64xf32> to vector<1x16x64xf32>
      %205 = tpu.concatenate %197, %198, %199, %200, %201, %202, %203, %204 in 0 : vector<1x16x64xf32>, vector<1x16x64xf32>, vector<1x16x64xf32>, vector<1x16x64xf32>, vector<1x16x64xf32>, vector<1x16x64xf32>, vector<1x16x64xf32>, vector<1x16x64xf32> -> vector<8x16x64xf32>
      %206 = vector.shape_cast %146 : vector<8x16xf32> to vector<8x16x1xf32>
      %207 = vector.broadcast %206 : vector<8x16x1xf32> to vector<8x16x64xf32>
      %208 = arith.mulf %205, %207 : vector<8x16x64xf32>
      %cst_77 = arith.constant dense<0.000000e+00> : vector<8x64xf32>
      %209 = vector.multi_reduction <add>, %208, %cst_77 [1] : vector<8x16x64xf32> to vector<8x64xf32>
      %210 = arith.index_cast %140 : i32 to index
      %c0_78 = arith.constant 0 : index
      %211 = vector.load %arg20[%210, %c0_78] : memref<32x64xf32, #tpu.memory_space<vmem>>, vector<8x64xf32>
      tpu.vector_store %arg20[%210, %c0_78], %209 {strides = array<i32>} : memref<32x64xf32, #tpu.memory_space<vmem>>, vector<8x64xf32>,
    }
    %c4_i32_54 = arith.constant 4 : i32
    %c0_55 = arith.constant 0 : index
    %c0_56 = arith.constant 0 : index
    %119 = vector.load %arg20[%c0_55, %c0_56] : memref<32x64xf32, #tpu.memory_space<vmem>>, vector<32x64xf32>
    %c0_57 = arith.constant 0 : index
    %c0_58 = arith.constant 0 : index
    %120 = vector.load %arg12[%c0_57, %c0_58] : memref<1x64xf32, #tpu.memory_space<vmem>>, vector<1x64xf32>
    %121 = vector.broadcast %120 : vector<1x64xf32> to vector<32x64xf32>
    %122 = arith.mulf %121, %81 : vector<32x64xf32>
    %123 = arith.addf %119, %122 : vector<32x64xf32>
    %124 = arith.negf %33 : vector<32x64xf32>
    %125 = math.exp %124 : vector<32x64xf32>
    %cst_59 = arith.constant 1.000000e+00 : f32
    %126 = vector.broadcast %cst_59 : f32 to vector<32x64xf32>
    %127 = arith.addf %126, %125 : vector<32x64xf32>
    %128 = arith.divf %126, %127 : vector<32x64xf32>
    %129 = arith.mulf %33, %128 : vector<32x64xf32>
    %130 = arith.mulf %123, %129 : vector<32x64xf32>
    %131 = arith.truncf %130 : vector<32x64xf32> to vector<32x64xbf16>
    %c0_60 = arith.constant 0 : index
    %c0_61 = arith.constant 0 : index
    %132 = vector.load %arg13[%c0_60, %c0_61] : memref<64x32xbf16, #tpu.memory_space<vmem>>, vector<64x32xbf16>
    %cst_62 = arith.constant dense<0.000000e+00> : vector<32x32xf32>
    %133 = tpu.matmul %131, %132, %cst_62 {dimension_numbers = #tpu.dot_dimension_numbers<[1], [0], [0], [1], [0, 0, 1, 1], [], []>} : vector<32x64xbf16>, vector<64x32xbf16>, vector<32x32xf32> -> vector<32x32xf32>
    %c0_63 = arith.constant 0 : index
    %c0_64 = arith.constant 0 : index
    %c0_65 = arith.constant 0 : index
    %134 = vector.load %arg14[%c0_63, %c0_64, %c0_65] : memref<1x32x32xf32, #tpu.memory_space<vmem>>, vector<1x32x32xf32>
    %135 = vector.shape_cast %134 : vector<1x32x32xf32> to vector<32x32xf32>
    %136 = vector.shape_cast %133 : vector<32x32xf32> to vector<1x32x32xf32>
    tpu.vector_store %arg14[%c0_63, %c0_64, %c0_65], %136 {strides = array<i32>} : memref<1x32x32xf32, #tpu.memory_space<vmem>>, vector<1x32x32xf32>,
    return
  }
  func.func @transform_0(%arg0: i32, %arg1: i32) -> (i32, i32, i32) {
    %c0_i32 = arith.constant 0 : i32
    %c0_i32_0 = arith.constant 0 : i32
    return %arg0, %arg1, %c0_i32 : i32, i32, i32
  }
  func.func @transform_1(%arg0: i32, %arg1: i32) -> (i32, i32) {
    %c0_i32 = arith.constant 0 : i32
    %c0_i32_0 = arith.constant 0 : i32
    %c0_i32_1 = arith.constant 0 : i32
    return %c0_i32, %c0_i32_0 : i32, i32
  }
  func.func @transform_2(%arg0: i32, %arg1: i32) -> (i32, i32) {
    %c0_i32 = arith.constant 0 : i32
    %c0_i32_0 = arith.constant 0 : i32
    %c0_i32_1 = arith.constant 0 : i32
    return %c0_i32, %c0_i32_0 : i32, i32
  }
  func.func @transform_3(%arg0: i32, %arg1: i32) -> (i32, i32) {
    %c0_i32 = arith.constant 0 : i32
    %c0_i32_0 = arith.constant 0 : i32
    %c0_i32_1 = arith.constant 0 : i32
    return %c0_i32, %c0_i32_0 : i32, i32
  }
  func.func @transform_4(%arg0: i32, %arg1: i32) -> (i32, i32) {
    %c0_i32 = arith.constant 0 : i32
    %c0_i32_0 = arith.constant 0 : i32
    %c0_i32_1 = arith.constant 0 : i32
    return %c0_i32, %c0_i32_0 : i32, i32
  }
  func.func @transform_5(%arg0: i32, %arg1: i32) -> (i32, i32) {
    %c0_i32 = arith.constant 0 : i32
    %c0_i32_0 = arith.constant 0 : i32
    %c0_i32_1 = arith.constant 0 : i32
    return %c0_i32, %c0_i32_0 : i32, i32
  }
  func.func @transform_6(%arg0: i32, %arg1: i32) -> (i32, i32) {
    %c0_i32 = arith.constant 0 : i32
    %c0_i32_0 = arith.constant 0 : i32
    %c0_i32_1 = arith.constant 0 : i32
    return %c0_i32, %c0_i32_0 : i32, i32
  }
  func.func @transform_7(%arg0: i32, %arg1: i32) -> (i32, i32) {
    %c0_i32 = arith.constant 0 : i32
    %c0_i32_0 = arith.constant 0 : i32
    %c0_i32_1 = arith.constant 0 : i32
    return %c0_i32, %c0_i32_0 : i32, i32
  }
  func.func @transform_8(%arg0: i32, %arg1: i32) -> (i32, i32) {
    %c0_i32 = arith.constant 0 : i32
    %c0_i32_0 = arith.constant 0 : i32
    %c0_i32_1 = arith.constant 0 : i32
    return %c0_i32, %c0_i32_0 : i32, i32
  }
  func.func @transform_9(%arg0: i32, %arg1: i32) -> (i32, i32) {
    %c0_i32 = arith.constant 0 : i32
    %c0_i32_0 = arith.constant 0 : i32
    %c0_i32_1 = arith.constant 0 : i32
    return %c0_i32, %c0_i32_0 : i32, i32
  }
  func.func @transform_10(%arg0: i32, %arg1: i32) -> (i32, i32) {
    %c0_i32 = arith.constant 0 : i32
    %c0_i32_0 = arith.constant 0 : i32
    %c0_i32_1 = arith.constant 0 : i32
    return %c0_i32, %c0_i32_0 : i32, i32
  }
  func.func @transform_11(%arg0: i32, %arg1: i32) -> (i32, i32) {
    %c0_i32 = arith.constant 0 : i32
    %c0_i32_0 = arith.constant 0 : i32
    %c0_i32_1 = arith.constant 0 : i32
    return %c0_i32, %c0_i32_0 : i32, i32
  }
  func.func @transform_12(%arg0: i32, %arg1: i32) -> (i32, i32, i32) {
    %c0_i32 = arith.constant 0 : i32
    %c0_i32_0 = arith.constant 0 : i32
    return %arg0, %arg1, %c0_i32 : i32, i32, i32
  }
}

</mosaic_0001>

<bundles_post_ra>
// kernel: _lambda_.2
= control target key start
LH: loop header
LB: loop body
LE: loop exit
PB: predicated region body
PF: predicated region fallthrough
CT: control target
= control target key end

     0   :  { %s3569_s21 = smov 0   ;;  %s3571_s22 = smov 0   ;;  %s4697_s0 = inlined_call_operand.vmem [shape: f32[2,64,32], index: 0, kind: input, shape index: {}, may-alias: {0,12}]   ;;  %s4698_s1 = inlined_call_operand.vmem [shape: f32[1,32], index: 1, kind: input, shape index: {}]   ;;  %s4699_s2 = inlined_call_operand.vmem [shape: f32[1,32], index: 2, kind: input, shape index: {}]   ;;  %s4700_s3 = inlined_call_operand.vmem [shape: bf16[32,128], index: 3, kind: input, shape index: {}]   ;;  %s4701_s4 = inlined_call_operand.vmem [shape: f32[4,64], index: 4, kind: input, shape index: {}]   ;;  %s4702_s5 = inlined_call_operand.vmem [shape: f32[1,64], index: 5, kind: input, shape index: {}]   ;;  %s4703_s6 = inlined_call_operand.vmem [shape: bf16[64,34], index: 6, kind: input, shape index: {}]   ;;  %s4704_s7 = inlined_call_operand.vmem [shape: bf16[2,64], index: 7, kind: input, shape index: {}]   ;;  %s4705_s8 = inlined_call_operand.vmem [shape: f32[1,64], index: 8, kind: input, shape index: {}]   ;;  %s4706_s9 = inlined_call_operand.vmem [shape: f32[16,64], index: 9, kind: input, shape index: {}]   ;;  %s4707_s10 = inlined_call_operand.vmem [shape: f32[1,64], index: 10, kind: input, shape index: {}]   ;;  %s4708_s11 = inlined_call_operand.vmem [shape: bf16[64,32], index: 11, kind: input, shape index: {}]   ;;  %s4709_s12 = inlined_call_operand.vmem [shape: f32[2,64,32], index: 12, kind: output, shape index: {}, may-alias: {0,12}]  }
   0x1   :  { %s3573_s23 = smov 0   ;;  %s3575_s24 = smov 0  }
   0x2   :  { %s3577_s25 = smov 0  }
   0x3 LB: > { %s31_s26 = sadd.s32 1, %s3486_s23  ;;  %s34_s27 = sadd.s32 1, %s3490_s24  ;;  %s3494_s25 = sphi %s3577_s25, %s22_s25   ;;  %s3490_s24 = sphi %s3575_s24, %s4874_s24   ;;  %s3486_s23 = sphi %s3573_s23, %s4873_s23   ;;  %s3482_s22 = sphi %s3571_s22, %s4872_s22   ;;  %s3478_s21 = sphi %s3569_s21, %s4871_s21  }
   0x4   : > { %p32_p0 = scmp.ge.s32.totalorder %s31_s26, 2  ;;  %p3100_p1 = scmp.ge.s32.totalorder %s3494_s25, 1 }
   0x5   : > { %p383_p2 = scmp.lt.s32.totalorder %s3494_s25, 5 }
   0x6   : > { %s4876_s26 = smov (%p32_p0, %s31_s26), 0  ;;  %s4878_s27 = smov (!%p32_p0, %s34_s27), %s3490_s24 }
   0x7   : > { %p384_p3 = pnand %p3100_p1, %p383_p2  ;;  %p36_p4 = scmp.ge.s32.totalorder %s4878_s27, 2 }
   0x9   : > { %s4880_s27 = smov (%p36_p4, %s4878_s27), 0  ;;  %387 = sbr.rel (%p384_p3) target bundleno = 1666 (0x682), region = 68 }
   0xe   : > { %s3101_s28 = sshll.u32 %s3478_s21, 2  ;;  %p434_p5 = scmp.lt.s32.totalorder %s3482_s22, 1 }
   0xf   : > { %p436_p6 = scmp.lt.s32.totalorder %s3101_s28, 7  ;;  %p3107_p7 = scmp.ne.s32.totalorder %s3478_s21, 0 }
  0x10   : > { %s4882_s22 = smov (!%p434_p5, %s3482_s22), 1 }
  0x11   : > { %s4884_s28 = smov (!%p436_p6, %s3101_s28), 7  ;;  %s3102_s29 = sshll.u32 %s4882_s22, 3 }
  0x12   : > { %s439_s30 = sadd.s32 %s3102_s29, %s4884_s28  ;;  %457 = sbr.rel (%p3107_p7) target bundleno = 26 (0x1a), region = 72 }
  0x13   : > { %s3103_s13 = sshll.u32 %s439_s30, 3 }
  0x14   : > { %s441_s16 = scalar_lea.vmem %s4697_s0, %s3103_s13  ;;  %s3605_s19 = scalar_lea.vmem %s4709_s12, %s3103_s13 }
  0x17   : > { %vm458_vm0 = vcmask 523264   ;;  %v3500_v0 = vmov 0.0  }
  0x18   : > { %459 = vst.msk [vmem:[#allocation2] sm:$0xff] %vm458_vm0, %v3500_v0  ;;  %460 = vst.msk [vmem:[#allocation2 + $0x8] sm:$0xff] %vm458_vm0, %v3500_v0 }
  0x19   : > { %461 = vst.msk [vmem:[#allocation3] sm:$0xff] %vm458_vm0, %v3500_v0  ;;  %464 = vst.msk [vmem:[#allocation3 + $0x18] sm:$0xff] %vm458_vm0, %v3500_v0 }
  0x1a PF: > { %v465_v1 = vld [vmem:[%s441_s16] sm:$0xff]  ;;  %vm469_vm1 = vcmask 261120   ;;  %v467_v2 = vld [vmem:[%s441_s16 + $0x10] sm:$0xff]  ;;  %v466_v3 = vld [vmem:[%s441_s16 + $0x8] sm:$0xff]  ;;  %vm774_vm2 = vcmask 523264   ;;  %vm924_vm9 = vcmask 1040384  }
  0x1b   : > { %v470_v4 = vsel %vm469_vm1, %v465_v1, 0.0  ;;  %v476_v5 = vsel %vm469_vm1, %v467_v2, 0.0  ;;  %v468_v6 = vld [vmem:[%s441_s16 + $0x18] sm:$0xff]  ;;  %v473_v7 = vsel %vm469_vm1, %v466_v3, 0.0  ;;  %v3258_v29 = vld [vmem:[%s4700_s3 + $0x8] sm:$0xff]   ;;  %v3259_v30 = vld [vmem:[%s4700_s3] sm:$0xff]  }
  0x1c   : > { %471 = vadd.xlane.f32.xlu0 %v470_v4  ;;  %477 = vadd.xlane.f32.xlu1 %v476_v5  ;;  %v479_v8 = vsel %vm469_vm1, %v468_v6, 0.0  ;;  %v3108_v45 = vld [vmem:[%s4698_s1] ss:$0 sm:$0xff]  ;;  %v3260_v63 = vld [vmem:[%s4703_s6 + $0x18] sm:$0xff]   ;;  %v3261_v0 = vld [vmem:[%s4703_s6 + $0x10] sm:$0xff]   ;;  %vm917_vm10 = vcmask 15360  }
  0x1d   : > { %3167 = vmatprep.subr.bf16.mxu1 %v3258_v29  ;;  %v3109_v50 = vld [vmem:[%s4699_s2] ss:$0 sm:$0xff]  ;;  %s3501_s29 = smov 110   ;;  %vm2547_vm11 = vcmask 130048   ;;  %s4494_s18 = smov 0  }
  0x1e   : > { %3168 = vmatpush3.bf16.msra.mxu1 %v3258_v29 }
  0x1f   : > { %3169 = vmatprep.subr.bf16.mxu1 %v3259_v30 }
  0x20   : > { %474 = vadd.xlane.f32.xlu0 %v473_v7  ;;  %480 = vadd.xlane.f32.xlu1 %v479_v8  ;;  %v621_v4 = vld [vmem:[#allocation3 + $0x18] sm:$0xff] }
  0x22   : > { %3170 = vmatpush3.bf16.msra.mxu1 %v3259_v30  ;;  %v3114_v30 = vld [vmem:[%s4701_s4 + $0x3] ss:$0 sm:$0xff] }
  0x23   : > { %3175 = vmatprep.subr.bf16.mxu1 %v3260_v63 }
  0xa5   : > { %v472_v9 = vpop.xlane.xlu0 %471  ;;  %v478_v10 = vpop.xlane.xlu1 %477 }
  0xa6   : > { %v483_v11 = vmul.f32 0.03125, %v472_v9  ;;  %v485_v12 = vmul.f32 0.03125, %v478_v10  ;;  %v648_v9 = vrot.slane %v621_v4, 7  ;;  %v694_v10 = vrot.slane %v621_v4, 6 }
  0xa8   : > { %v487_v13 = vsub.f32 %v465_v1, %v483_v11  ;;  %v489_v14 = vsub.f32 %v467_v2, %v485_v12  ;;  %v3262_v1 = vld [vmem:[%s4703_s6 + $0x8] sm:$0xff]   ;;  %v3263_v2 = vld [vmem:[%s4703_s6] sm:$0xff]  }
  0xa9   : > { %v475_v15 = vpop.xlane.xlu0 %474  ;;  %v481_v16 = vpop.xlane.xlu1 %480 }
  0xaa   : > { %v484_v17 = vmul.f32 0.03125, %v475_v15  ;;  %v486_v18 = vmul.f32 0.03125, %v481_v16  ;;  %v491_v19 = vmul.f32 %v487_v13, %v487_v13  ;;  %v493_v20 = vmul.f32 %v489_v14, %v489_v14 }
  0xac   : > { %v488_v21 = vsub.f32 %v466_v3, %v484_v17  ;;  %v490_v22 = vsub.f32 %v468_v6, %v486_v18  ;;  %v495_v23 = vsel %vm469_vm1, %v491_v19, 0.0  ;;  %v501_v24 = vsel %vm469_vm1, %v493_v20, 0.0  ;;  %v618_v6 = vld [vmem:[#allocation3] sm:$0xff] }
  0xad   : > { %496 = vadd.xlane.f32.xlu0 %v495_v23  ;;  %v622_v3 = vlaneseq  ;;  %v645_v7 = vrot.slane %v618_v6, 7  ;;  %v691_v8 = vrot.slane %v618_v6, 6  ;;  %v3115_v23 = vld [vmem:[%s4701_s4 + $0x2] ss:$0 sm:$0xff] }
  0xae   : > { %v492_v25 = vmul.f32 %v488_v21, %v488_v21  ;;  %v494_v26 = vmul.f32 %v490_v22, %v490_v22 }
  0xaf   : > { %v3641_v5 = vshrl.u32 %v622_v3, 7 }
  0xb0   : > { %v498_v27 = vsel %vm469_vm1, %v492_v25, 0.0  ;;  %v504_v28 = vsel %vm469_vm1, %v494_v26, 0.0 }
  0xb1   : > { %502 = vadd.xlane.f32.xlu0 %v501_v24  ;;  %499 = vadd.xlane.f32.xlu1 %v498_v27  ;;  %vm640_vm3 = vcmp.lt.s32.totalorder %v3641_v5, 1  ;;  %vm686_vm4 = vcmp.lt.s32.totalorder %v3641_v5, 2  ;;  %vm653_vm5 = vcmp.ge.s32.totalorder %v3641_v5, 1  ;;  %vm732_vm6 = vcmp.lt.s32.totalorder %v3641_v5, 3 }
  0xb2   : > { %v652_v15 = vsel %vm640_vm3, %v648_v9, %v645_v7  ;;  %v698_v16 = vsel %vm686_vm4, %v694_v10, %v691_v8  ;;  %vm699_vm7 = vcmp.ge.s32.totalorder %v3641_v5, 2  ;;  %vm745_vm8 = vcmp.ge.s32.totalorder %v3641_v5, 3 }
  0xb5   : > { %505 = vadd.xlane.f32.xlu1 %v504_v28 }
 0x136   : > { %v497_v31 = vpop.xlane.xlu0 %496 }
 0x137   : > { %v507_v32 = vmul.f32 0.03125, %v497_v31 }
 0x139   : > { %v511_v33 = vadd.f32 1e-05, %v507_v32 }
 0x13a   : > { %v500_v34 = vpop.xlane.xlu1 %499  ;;  %v503_v35 = vpop.xlane.xlu0 %502 }
 0x13b   : > { %3264 = vrsqrt.f32 %v511_v33  ;;  %v508_v36 = vmul.f32 0.03125, %v500_v34  ;;  %v509_v37 = vmul.f32 0.03125, %v503_v35  ;;  %v3116_v35 = vld [vmem:[%s4701_s4 + $0x1] ss:$0 sm:$0xff] }
 0x13d   : > { %v512_v38 = vadd.f32 1e-05, %v508_v36  ;;  %v513_v39 = vadd.f32 1e-05, %v509_v37 }
 0x13e   : > { %v506_v40 = vpop.xlane.xlu1 %505 }
 0x13f   : > { %3266 = vrsqrt.f32 %v512_v38  ;;  %v510_v41 = vmul.f32 0.03125, %v506_v40 }
 0x140   : > { %3268 = vrsqrt.f32 %v513_v39 }
 0x141   : > { %v514_v42 = vadd.f32 1e-05, %v510_v41 }
 0x143   : > { %3270 = vrsqrt.f32 %v514_v42 }
 0x148   : > { %v3265_v43 = vpop.eup %3264 }
 0x149   : > { %v519_v44 = vmul.f32 %v3265_v43, %v487_v13  ;;  %v737_v13 = vrot.slane %v618_v6, 5 }
 0x14b   : > { %v530_v49 = vmul.f32 %v3108_v45, %v519_v44  ;;  %v3117_v44 = vld [vmem:[%s4701_s4] ss:$0 sm:$0xff] }
 0x14c   : > { %v3267_v46 = vpop.eup %3266 }
 0x14d   : > { %v3269_v47 = vpop.eup %3268  ;;  %v520_v48 = vmul.f32 %v3267_v46, %v488_v21  ;;  %v541_v54 = vadd.f32 %v3109_v50, %v530_v49 }
 0x14e   : > { %v521_v51 = vmul.f32 %v3269_v47, %v489_v14  ;;  %v740_v14 = vrot.slane %v621_v4, 5 }
 0x14f   : > { %v531_v52 = vmul.f32 %v3108_v45, %v520_v48 }
 0x150   : > { %v3271_v53 = vpop.eup %3270  ;;  %v532_v57 = vmul.f32 %v3108_v45, %v521_v51  ;;  %v744_v28 = vsel %vm732_vm6, %v740_v14, %v737_v13 }
 0x151   : > { %v542_v55 = vadd.f32 %v3109_v50, %v531_v52  ;;  %v522_v56 = vmul.f32 %v3271_v53, %v490_v22 }
 0x152   : > { %v543_v60 = vadd.f32 %v3109_v50, %v532_v57 }
 0x153   : > { %v545_v58 = vpack.c.bf16 %v542_v55, %v541_v54  ;;  %v533_v59 = vmul.f32 %v3108_v45, %v522_v56 }
 0x155   : > { %3171 = vmatprep.mubr.msk.bf16.mxu1 %vm469_vm1, %v545_v58  ;;  %v544_v61 = vadd.f32 %v3109_v50, %v533_v59 }
 0x157   : > { %v546_v62 = vpack.c.bf16 %v544_v61, %v543_v60 }
 0x159   : > { %3172 = vmatmul.mubr.msk.bf16.vlgmr.msra.gmra.mxu1 %vm469_vm1, %v546_v62 }
 0x15a   : > { %3176 = vmatpush3.bf16.msra.mxu1 %v3260_v63 }
 0x15b   : > { %3177 = vmatprep.subr.bf16.mxu1 %v3261_v0 }
 0x15e   : > { %3178 = vmatpush3.bf16.msra.mxu1 %v3261_v0  ;;  %v3118_v0 = vld [vmem:[%s4702_s5] ss:$0 sm:$0xff] }
 0x15f   : > { %3179 = vmatprep.subr.bf16.mxu1 %v3262_v1 }
 0x162   : > { %3180 = vmatpush3.bf16.msra.mxu1 %v3262_v1 }
 0x163   : > { %3181 = vmatprep.subr.bf16.mxu1 %v3263_v2 }
 0x166   : > { %3182 = vmatpush3.bf16.msra.mxu1 %v3263_v2 }
 0x219   : > { %v3643_v11 = vpop.f32.mrf.mxu1 }
 0x21a   : > { %4733 = vst [vmem:[#allocation8_spill] sm:$0xff] %v3643_v11  ;;  %v638_v17 = vrot.slane %v3643_v11, 7  ;;  %v684_v18 = vrot.slane %v3643_v11, 6  ;;  %v730_v26 = vrot.slane %v3643_v11, 5  ;;  %v634_v45 = vmul.f32 %v3643_v11, %v3114_v30 }
 0x21b   : > { %v3647_v12 = vpop.f32.mrf.mxu1 }
 0x21c   : > { %4734 = vst [vmem:[#allocation9_spill] sm:$0xff] %v3647_v12  ;;  %775 = vst.msk [vmem:[#allocation3] sm:$0xff] %vm774_vm2, %v3647_v12  ;;  %v636_v19 = vrot.slane %v3647_v12, 7  ;;  %v682_v21 = vrot.slane %v3647_v12, 6  ;;  %v728_v27 = vrot.slane %v3647_v12, 5  ;;  %v632_v36 = vmul.f32 %v3114_v30, %v3647_v12 }
 0x21d   : > { %v3660_v20 = vpop.f32.mrf.mxu1 }
 0x21e   : > { %4735 = vst [vmem:[#allocation10_spill] sm:$0xff] %v3660_v20  ;;  %v639_v22 = vrot.slane %v3660_v20, 7  ;;  %v685_v24 = vrot.slane %v3660_v20, 6  ;;  %v731_v25 = vrot.slane %v3660_v20, 5  ;;  %778 = vst.msk [vmem:[#allocation3 + $0x18] sm:$0xff] %vm774_vm2, %v3660_v20  ;;  %v635_v37 = vmul.f32 %v3660_v20, %v3114_v30 }
 0x21f   : > { %v3677_v29 = vpop.f32.mrf.mxu1 }
 0x220   : > { %4736 = vst [vmem:[#allocation11_spill] sm:$0xff] %v3677_v29  ;;  %v641_v31 = vsel %vm640_vm3, %v638_v17, %v639_v22  ;;  %v644_v32 = vsel %vm640_vm3, %v639_v22, %v636_v19  ;;  %v687_v33 = vsel %vm686_vm4, %v684_v18, %v685_v24  ;;  %v690_v34 = vsel %vm686_vm4, %v685_v24, %v682_v21 }
 0x221   : > { %v665_v38 = vsel %vm653_vm5, %v644_v32, %v652_v15  ;;  %v677_v39 = vmul.f32 %v3115_v23, %v641_v31  ;;  %v711_v41 = vsel %vm699_vm7, %v690_v34, %v698_v16  ;;  %v733_v42 = vsel %vm732_vm6, %v730_v26, %v731_v25 }
 0x222   : > { %v674_v40 = vmul.f32 %v3115_v23, %v665_v38  ;;  %v736_v43 = vsel %vm732_vm6, %v731_v25, %v728_v27  ;;  %v723_v47 = vmul.f32 %v3116_v35, %v687_v33  ;;  %v637_v48 = vrot.slane %v3677_v29, 7 }
 0x223   : > { %v681_v46 = vadd.f32 %v677_v39, %v635_v37  ;;  %v683_v49 = vrot.slane %v3677_v29, 6  ;;  %v729_v50 = vrot.slane %v3677_v29, 5  ;;  %v720_v52 = vmul.f32 %v3116_v35, %v711_v41 }
 0x224   : > { %v678_v51 = vadd.f32 %v674_v40, %v632_v36  ;;  %v757_v54 = vsel %vm745_vm8, %v736_v43, %v744_v28  ;;  %v769_v55 = vmul.f32 %v3117_v44, %v733_v42  ;;  %v642_v56 = vsel %vm640_vm3, %v637_v48, %v638_v17 }
 0x225   : > { %v727_v53 = vadd.f32 %v723_v47, %v681_v46  ;;  %v643_v57 = vsel %vm640_vm3, %v636_v19, %v637_v48  ;;  %v688_v58 = vsel %vm686_vm4, %v683_v49, %v684_v18  ;;  %v689_v59 = vsel %vm686_vm4, %v682_v21, %v683_v49  ;;  %v909_v47 = vld [vmem:[%s4704_s7] sm:$0x1] }
 0x226   : > { %v633_v61 = vmul.f32 %v3114_v30, %v3677_v29  ;;  %v675_v62 = vmul.f32 %v3115_v23, %v643_v57  ;;  %v676_v63 = vmul.f32 %v3115_v23, %v642_v56  ;;  %v734_v1 = vsel %vm732_vm6, %v729_v50, %v730_v26  ;;  %3205 = vmatprep.subr.msk.bf16.mxu0 %vm924_vm9, %v909_v47 }
 0x227   : > { %v773_v60 = vadd.f32 %v769_v55, %v727_v53  ;;  %v735_v2 = vsel %vm732_vm6, %v728_v27, %v729_v50  ;;  %v724_v3 = vadd.f32 %v720_v52, %v678_v51  ;;  %v766_v4 = vmul.f32 %v3117_v44, %v757_v54 }
 0x228   : > { %v679_v6 = vadd.f32 %v675_v62, %v633_v61  ;;  %v680_v7 = vadd.f32 %v676_v63, %v634_v45  ;;  %v721_v8 = vmul.f32 %v3116_v35, %v689_v59  ;;  %v722_v9 = vmul.f32 %v3116_v35, %v688_v58 }
 0x229   : > { %v770_v10 = vadd.f32 %v766_v4, %v724_v3  ;;  %v789_v13 = vadd.f32 %v3118_v0, %v773_v60  ;;  %v767_v16 = vmul.f32 %v3117_v44, %v735_v2  ;;  %v768_v17 = vmul.f32 %v3117_v44, %v734_v1 }
 0x22a   : > { %v725_v14 = vadd.f32 %v721_v8, %v679_v6  ;;  %v726_v15 = vadd.f32 %v722_v9, %v680_v7  ;;  %v926_v48 = vsel %vm924_vm9, %v909_v47, 0  ;;  %v3746_v49 = vsub.s32 0, %v3641_v5 }
 0x22b   : > { %v786_v18 = vadd.f32 %v3118_v0, %v770_v10  ;;  %v3122_v19 = vmul.f32 -1.442695, %v789_v13  ;;  %3188 = vmatpush3.bf16.msra.mxu0 %v926_v48  ;;  %v3753_v52 = vsub.s32 1, %v3641_v5  ;;  %v3760_v56 = vsub.s32 2, %v3641_v5 }
 0x22c   : > { %v772_v21 = vadd.f32 %v768_v17, %v726_v15  ;;  %v771_v22 = vadd.f32 %v767_v16, %v725_v14  ;;  %v3770_v61 = vsub.s32 3, %v3641_v5  ;;  %v3775_v63 = vsub.s32 4, %v3641_v5 }
 0x22d   : > { %v3119_v23 = vmul.f32 -1.442695, %v786_v18  ;;  %3272 = vpow2.f32 %v3122_v19  ;;  %4741 = vst [vmem:[#allocation16_spill] sm:$0xff] %v3753_v52  ;;  %4742 = vst [vmem:[#allocation17_spill] sm:$0xff] %v3760_v56  ;;  %v3780_v1 = vsub.s32 5, %v3641_v5  ;;  %v3785_v3 = vsub.s32 6, %v3641_v5 }
 0x22e   : > { %v787_v24 = vadd.f32 %v3118_v0, %v771_v22  ;;  %v788_v25 = vadd.f32 %v3118_v0, %v772_v21  ;;  %4743 = vst [vmem:[#allocation18_spill] sm:$0xff] %v3770_v61  ;;  %4744 = vst [vmem:[#allocation19_spill] sm:$0xff] %v3775_v63  ;;  %v3790_v6 = vsub.s32 7, %v3641_v5 }
 0x22f   : > { %3274 = vpow2.f32 %v3119_v23  ;;  %4745 = vst [vmem:[#allocation20_spill] sm:$0xff] %v3780_v1  ;;  %4746 = vst [vmem:[#allocation21_spill] sm:$0xff] %v3785_v3 }
 0x230   : > { %v3120_v26 = vmul.f32 -1.442695, %v787_v24  ;;  %v3121_v27 = vmul.f32 -1.442695, %v788_v25  ;;  %4747 = vst [vmem:[#allocation22_spill] sm:$0xff] %v3790_v6 }
 0x232   : > { %3276 = vpow2.f32 %v3120_v26 }
 0x233   : > { %3278 = vpow2.f32 %v3121_v27 }
 0x23a   : > { %v3273_v28 = vpop.eup %3272 }
 0x23b   : > { %v805_v32 = vadd.f32 1.0, %v3273_v28 }
 0x23c   : > { %v3275_v30 = vpop.eup %3274 }
 0x23d   : > { %v802_v31 = vadd.f32 1.0, %v3275_v30 }
 0x23f   : > { %v3277_v33 = vpop.eup %3276  ;;  %3280 = vrcp.f32 %v802_v31 }
 0x240   : > { %v3279_v34 = vpop.eup %3278  ;;  %v803_v35 = vadd.f32 1.0, %v3277_v33  ;;  %3282 = vrcp.f32 %v805_v32 }
 0x241   : > { %v804_v36 = vadd.f32 1.0, %v3279_v34 }
 0x242   : > { %3284 = vrcp.f32 %v803_v35 }
 0x243   : > { %3286 = vrcp.f32 %v804_v36 }
 0x24c   : > { %v3281_v37 = vpop.eup %3280 }
 0x24d   : > { %v3283_v38 = vpop.eup %3282  ;;  %v3728_v39 = vmul.f32 %v3281_v37, %v786_v18 }
 0x24e   : > { %v3734_v44 = vmul.f32 %v3283_v38, %v789_v13 }
 0x24f   : > { %4737 = vst [vmem:[#allocation12_spill] sm:$0xff] %v3728_v39  ;;  %v3285_v40 = vpop.eup %3284 }
 0x250   : > { %v3287_v41 = vpop.eup %3286  ;;  %v3730_v42 = vmul.f32 %v3285_v40, %v787_v24  ;;  %4740 = vst [vmem:[#allocation15_spill] sm:$0xff] %v3734_v44 }
 0x251   : > { %v3732_v43 = vmul.f32 %v3287_v41, %v788_v25 }
 0x252   : > { %4738 = vst [vmem:[#allocation13_spill] sm:$0xff] %v3730_v42  ;;  %v818_v45 = vpack.c.bf16 %v3730_v42, %v3728_v39 }
 0x253   : > { %4739 = vst [vmem:[#allocation14_spill] sm:$0xff] %v3732_v43  ;;  %v819_v46 = vpack.c.bf16 %v3734_v44, %v3732_v43 }
 0x254   : > { %3183 = vmatprep.mubr.msk.bf16.mxu1 %vm774_vm2, %v818_v45 }
 0x255   : > { %3184 = vmatmul.mubr.msk.bf16.vlgmr.msra.gmra.mxu1 %vm774_vm2, %v819_v46 }
 0x315   : > { %v3748_v50 = vpop.f32.mrf.mxu1 }
 0x316   : > { %v1850_v51 = vrot.slane %v3748_v50, %v3746_v49  ;;  %v1862_v55 = vrot.slane %v3748_v50, %v3753_v52  ;;  %v1874_v60 = vrot.slane %v3748_v50, %v3760_v56  ;;  %v1886_v62 = vrot.slane %v3748_v50, %v3770_v61 }
 0x317   : > { %v892_v53 = vpop.f32.mrf.mxu1  ;;  %v1898_v0 = vrot.slane %v3748_v50, %v3775_v63  ;;  %v1910_v2 = vrot.slane %v3748_v50, %v3780_v1  ;;  %v1922_v4 = vrot.slane %v3748_v50, %v3785_v3  ;;  %v1934_v7 = vrot.slane %v3748_v50, %v3790_v6 }
 0x318   : > { %1857 = vbcast.lane.b32.xlu1 %v1850_v51, 266  ;;  %1853 = vbcast.lane.b32.xlu0 %v1850_v51, 258  ;;  %v1658_v8 = vrot.slane %v892_v53, %v3746_v49  ;;  %v1670_v9 = vrot.slane %v892_v53, %v3753_v52  ;;  %v1682_v10 = vrot.slane %v892_v53, %v3760_v56 }
 0x319   : > { %v3755_v54 = vpop.f32.mrf.mxu1  ;;  %v1694_v13 = vrot.slane %v892_v53, %v3770_v61  ;;  %v1706_v14 = vrot.slane %v892_v53, %v3775_v63  ;;  %v1718_v15 = vrot.slane %v892_v53, %v3780_v1  ;;  %v1730_v16 = vrot.slane %v892_v53, %v3785_v3 }
 0x31a   : > { %v908_v59 = vpack.c.bf16 %v3755_v54, %v3748_v50  ;;  %v1742_v17 = vrot.slane %v892_v53, %v3790_v6  ;;  %v1946_v18 = vrot.slane %v3755_v54, %v3746_v49  ;;  %v1958_v19 = vrot.slane %v3755_v54, %v3753_v52 }
 0x31b   : > { %v3762_v57 = vpop.f32.mrf.mxu1  ;;  %v1970_v21 = vrot.slane %v3755_v54, %v3760_v56  ;;  %v1982_v22 = vrot.slane %v3755_v54, %v3770_v61  ;;  %v1994_v23 = vrot.slane %v3755_v54, %v3775_v63  ;;  %v2006_v24 = vrot.slane %v3755_v54, %v3780_v1 }
 0x31c   : > { %1869 = vbcast.lane.b32.xlu1 %v1862_v55, 266  ;;  %1865 = vbcast.lane.b32.xlu0 %v1862_v55, 258  ;;  %v907_v58 = vpack.c.bf16 %v3762_v57, %v892_v53  ;;  %v2018_v25 = vrot.slane %v3755_v54, %v3785_v3  ;;  %v2030_v26 = vrot.slane %v3755_v54, %v3790_v6 }
 0x31d   : > { %v1754_v27 = vrot.slane %v3762_v57, %v3746_v49  ;;  %v1766_v28 = vrot.slane %v3762_v57, %v3753_v52  ;;  %v1778_v30 = vrot.slane %v3762_v57, %v3760_v56  ;;  %v1790_v31 = vrot.slane %v3762_v57, %v3770_v61 }
 0x31e   : > { %3189 = vmatprep.mubr.msk.bf16.mxu0 %vm917_vm10, %v907_v58  ;;  %v1802_v32 = vrot.slane %v3762_v57, %v3775_v63  ;;  %v1814_v35 = vrot.slane %v3762_v57, %v3780_v1  ;;  %v1826_v38 = vrot.slane %v3762_v57, %v3785_v3  ;;  %v1838_v45 = vrot.slane %v3762_v57, %v3790_v6 }
 0x31f   : > { %3190 = vmatmul.mubr.msk.bf16.vlgmr.msra.gmra.mxu0 %vm917_vm10, %v908_v59 }
 0x320   : > { %1881 = vbcast.lane.b32.xlu1 %v1874_v60, 266  ;;  %1877 = vbcast.lane.b32.xlu0 %v1874_v60, 258 }
 0x324   : > { %1893 = vbcast.lane.b32.xlu1 %v1886_v62, 266  ;;  %1889 = vbcast.lane.b32.xlu0 %v1886_v62, 258 }
 0x328   : > { %1905 = vbcast.lane.b32.xlu1 %v1898_v0, 266  ;;  %1901 = vbcast.lane.b32.xlu0 %v1898_v0, 258 }
 0x32c   : > { %1917 = vbcast.lane.b32.xlu1 %v1910_v2, 266  ;;  %1913 = vbcast.lane.b32.xlu0 %v1910_v2, 258 }
 0x330   : > { %1929 = vbcast.lane.b32.xlu1 %v1922_v4, 266  ;;  %1925 = vbcast.lane.b32.xlu0 %v1922_v4, 258 }
 0x334   : > { %1941 = vbcast.lane.b32.xlu1 %v1934_v7, 266  ;;  %1937 = vbcast.lane.b32.xlu0 %v1934_v7, 258 }
 0x338   : > { %2535 = vrot.lane.b32.xlu0 %v892_v53, %s3501_s29  ;;  %1665 = vbcast.lane.b32.xlu1 %v1658_v8, 266 }
 0x33c   : > { %1673 = vbcast.lane.b32.xlu1 %v1670_v9, 258  ;;  %1661 = vbcast.lane.b32.xlu0 %v1658_v8, 258 }
 0x340   : > { %1677 = vbcast.lane.b32.xlu1 %v1670_v9, 266  ;;  %1685 = vbcast.lane.b32.xlu0 %v1682_v10, 258 }
 0x344   : > { %1689 = vbcast.lane.b32.xlu1 %v1682_v10, 266  ;;  %1697 = vbcast.lane.b32.xlu0 %v1694_v13, 258 }
 0x348   : > { %1701 = vbcast.lane.b32.xlu1 %v1694_v13, 266  ;;  %1709 = vbcast.lane.b32.xlu0 %v1706_v14, 258 }
 0x34c   : > { %1713 = vbcast.lane.b32.xlu1 %v1706_v14, 266  ;;  %1721 = vbcast.lane.b32.xlu0 %v1718_v15, 258 }
 0x350   : > { %1725 = vbcast.lane.b32.xlu1 %v1718_v15, 266  ;;  %1733 = vbcast.lane.b32.xlu0 %v1730_v16, 258 }
 0x354   : > { %1737 = vbcast.lane.b32.xlu1 %v1730_v16, 266  ;;  %1745 = vbcast.lane.b32.xlu0 %v1742_v17, 258 }
 0x358   : > { %1749 = vbcast.lane.b32.xlu1 %v1742_v17, 266  ;;  %1949 = vbcast.lane.b32.xlu0 %v1946_v18, 258 }
 0x35c   : > { %1953 = vbcast.lane.b32.xlu1 %v1946_v18, 266  ;;  %1961 = vbcast.lane.b32.xlu0 %v1958_v19, 258 }
 0x360   : > { %1965 = vbcast.lane.b32.xlu1 %v1958_v19, 266  ;;  %1973 = vbcast.lane.b32.xlu0 %v1970_v21, 258 }
 0x364   : > { %1977 = vbcast.lane.b32.xlu1 %v1970_v21, 266  ;;  %1985 = vbcast.lane.b32.xlu0 %v1982_v22, 258 }
 0x368   : > { %1989 = vbcast.lane.b32.xlu1 %v1982_v22, 266  ;;  %1997 = vbcast.lane.b32.xlu0 %v1994_v23, 258 }
 0x36c   : > { %2001 = vbcast.lane.b32.xlu1 %v1994_v23, 266  ;;  %2009 = vbcast.lane.b32.xlu0 %v2006_v24, 258 }
 0x370   : > { %2013 = vbcast.lane.b32.xlu1 %v2006_v24, 266  ;;  %2021 = vbcast.lane.b32.xlu0 %v2018_v25, 258 }
 0x374   : > { %2025 = vbcast.lane.b32.xlu1 %v2018_v25, 266  ;;  %2033 = vbcast.lane.b32.xlu0 %v2030_v26, 258 }
 0x378   : > { %2037 = vbcast.lane.b32.xlu1 %v2030_v26, 266  ;;  %1757 = vbcast.lane.b32.xlu0 %v1754_v27, 258 }
 0x37c   : > { %2537 = vrot.lane.b32.xlu1 %v3762_v57, %s3501_s29  ;;  %1769 = vbcast.lane.b32.xlu0 %v1766_v28, 258 }
 0x380   : > { %1761 = vbcast.lane.b32.xlu1 %v1754_v27, 266  ;;  %1781 = vbcast.lane.b32.xlu0 %v1778_v30, 258 }
 0x384   : > { %1773 = vbcast.lane.b32.xlu1 %v1766_v28, 266  ;;  %1793 = vbcast.lane.b32.xlu0 %v1790_v31, 258 }
 0x388   : > { %1785 = vbcast.lane.b32.xlu1 %v1778_v30, 266  ;;  %1805 = vbcast.lane.b32.xlu0 %v1802_v32, 258 }
 0x38a   : > { %v3831_v33 = vpop.permute.xlu1 %1857  ;;  %v3833_v34 = vpop.permute.xlu0 %1853 }
 0x38c   : > { %1797 = vbcast.lane.b32.xlu1 %v1790_v31, 266  ;;  %1817 = vbcast.lane.b32.xlu0 %v1814_v35, 258  ;;  %v3129_v31 = vld [vmem:[%s4705_s8] ss:$0 sm:$0xff] }
 0x38e   : > { %v3837_v36 = vpop.permute.xlu1 %1869  ;;  %v3839_v37 = vpop.permute.xlu0 %1865 }
 0x390   : > { %1809 = vbcast.lane.b32.xlu1 %v1802_v32, 266  ;;  %1829 = vbcast.lane.b32.xlu0 %v1826_v38, 258 }
 0x392   : > { %v3843_v40 = vpop.permute.xlu1 %1881  ;;  %v3845_v41 = vpop.permute.xlu0 %1877 }
 0x394   : > { %1821 = vbcast.lane.b32.xlu1 %v1814_v35, 266  ;;  %1841 = vbcast.lane.b32.xlu0 %v1838_v45, 258 }
 0x396   : > { %v3849_v46 = vpop.permute.xlu1 %1893  ;;  %v3851_v47 = vpop.permute.xlu0 %1889 }
 0x398   : > { %1833 = vbcast.lane.b32.xlu1 %v1826_v38, 266  ;;  %2539 = vrot.lane.b32.xlu0 %v3748_v50, %s3501_s29 }
 0x39a   : > { %v3855_v48 = vpop.permute.xlu1 %1905  ;;  %v3857_v51 = vpop.permute.xlu0 %1901 }
 0x39c   : > { %1845 = vbcast.lane.b32.xlu1 %v1838_v45, 266 }
 0x39e   : > { %v3859_v53 = vpop.permute.xlu1 %1917  ;;  %v3861_v55 = vpop.permute.xlu0 %1913 }
 0x3a0   : > { %2541 = vrot.lane.b32.xlu1 %v3755_v54, %s3501_s29 }
 0x3a2   : > { %v3865_v57 = vpop.permute.xlu1 %1929  ;;  %v3867_v58 = vpop.permute.xlu0 %1925 }
 0x3a6   : > { %v3869_v59 = vpop.permute.xlu1 %1941  ;;  %v3871_v60 = vpop.permute.xlu0 %1937 }
 0x3aa   : > { %v2536_v50 = vpop.permute.xlu0 %2535  ;;  %v3873_v62 = vpop.permute.xlu1 %1665 }
 0x3ab   : > { %2548 = vst.msk [vmem:[#allocation6] sm:$0xff] %vm2547_vm11, %v2536_v50 }
 0x3ae   : > { %v3876_v0 = vpop.permute.xlu1 %1673  ;;  %v3878_v2 = vpop.permute.xlu0 %1661 }
 0x3af   : > { %4748 = vst [vmem:[#allocation23_spill] sm:$0xff] %v3876_v0 }
 0x3b2   : > { %v3880_v4 = vpop.permute.xlu1 %1677  ;;  %v3882_v54 = vpop.permute.xlu0 %1685 }
 0x3b3   : > { %4749 = vst [vmem:[#allocation24_spill] sm:$0xff] %v3880_v4  ;;  %4750 = vst [vmem:[#allocation25_spill] sm:$0xff] %v3882_v54 }
 0x3b6   : > { %v3884_v7 = vpop.permute.xlu1 %1689  ;;  %v3886_v8 = vpop.permute.xlu0 %1697 }
 0x3b7   : > { %4751 = vst [vmem:[#allocation26_spill] sm:$0xff] %v3884_v7  ;;  %4752 = vst [vmem:[#allocation27_spill] sm:$0xff] %v3886_v8 }
 0x3ba   : > { %v3888_v9 = vpop.permute.xlu1 %1701  ;;  %v3890_v10 = vpop.permute.xlu0 %1709 }
 0x3bb   : > { %4753 = vst [vmem:[#allocation28_spill] sm:$0xff] %v3888_v9  ;;  %4754 = vst [vmem:[#allocation29_spill] sm:$0xff] %v3890_v10 }
 0x3be   : > { %v3892_v13 = vpop.permute.xlu1 %1713  ;;  %v3894_v14 = vpop.permute.xlu0 %1721 }
 0x3bf   : > { %4755 = vst [vmem:[#allocation30_spill] sm:$0xff] %v3892_v13  ;;  %4756 = vst [vmem:[#allocation31_spill] sm:$0xff] %v3894_v14 }
 0x3c2   : > { %v3896_v15 = vpop.permute.xlu1 %1725  ;;  %v3898_v16 = vpop.permute.xlu0 %1733 }
 0x3c3   : > { %4757 = vst [vmem:[#allocation32_spill] sm:$0xff] %v3896_v15  ;;  %4758 = vst [vmem:[#allocation33_spill] sm:$0xff] %v3898_v16 }
 0x3c6   : > { %v3900_v17 = vpop.permute.xlu1 %1737  ;;  %v3902_v18 = vpop.permute.xlu0 %1745 }
 0x3c7   : > { %4759 = vst [vmem:[#allocation34_spill] sm:$0xff] %v3900_v17  ;;  %4760 = vst [vmem:[#allocation35_spill] sm:$0xff] %v3902_v18 }
 0x3ca   : > { %v3904_v19 = vpop.permute.xlu1 %1749  ;;  %v3906_v21 = vpop.permute.xlu0 %1949 }
 0x3cb   : > { %4761 = vst [vmem:[#allocation36_spill] sm:$0xff] %v3904_v19  ;;  %4762 = vst [vmem:[#allocation37_spill] sm:$0xff] %v3906_v21 }
 0x3ce   : > { %v3908_v22 = vpop.permute.xlu1 %1953  ;;  %v3910_v23 = vpop.permute.xlu0 %1961 }
 0x3cf   : > { %4763 = vst [vmem:[#allocation38_spill] sm:$0xff] %v3908_v22  ;;  %4764 = vst [vmem:[#allocation39_spill] sm:$0xff] %v3910_v23 }
 0x3d2   : > { %v3912_v24 = vpop.permute.xlu1 %1965  ;;  %v3914_v25 = vpop.permute.xlu0 %1973 }
 0x3d3   : > { %4765 = vst [vmem:[#allocation40_spill] sm:$0xff] %v3912_v24  ;;  %4766 = vst [vmem:[#allocation41_spill] sm:$0xff] %v3914_v25 }
 0x3d6   : > { %v3916_v26 = vpop.permute.xlu1 %1977  ;;  %v3918_v27 = vpop.permute.xlu0 %1985 }
 0x3d7   : > { %4767 = vst [vmem:[#allocation42_spill] sm:$0xff] %v3916_v26  ;;  %4768 = vst [vmem:[#allocation43_spill] sm:$0xff] %v3918_v27 }
 0x3da   : > { %v3920_v28 = vpop.permute.xlu1 %1989  ;;  %v3922_v30 = vpop.permute.xlu0 %1997 }
 0x3db   : > { %4769 = vst [vmem:[#allocation44_spill] sm:$0xff] %v3920_v28  ;;  %4770 = vst [vmem:[#allocation45_spill] sm:$0xff] %v3922_v30 }
 0x3de   : > { %v3927_v32 = vpop.permute.xlu1 %2001  ;;  %v3929_v35 = vpop.permute.xlu0 %2009 }
 0x3df   : > { %4771 = vst [vmem:[#allocation46_spill] sm:$0xff] %v3927_v32  ;;  %4772 = vst [vmem:[#allocation47_spill] sm:$0xff] %v3929_v35  ;;  %v3191_v38 = vpop.f32.mrf.mxu0 }
 0x3e0   : > { %v3931_v45 = vadd.f32 %v3191_v38, %v3129_v31 }
 0x3e1   : > { %v962_v50 = vpop.f32.mrf.mxu0 }
 0x3e2   : > { %v983_v29 = vand.u32 2147483647, %v3931_v45  ;;  %v3934_v20 = vadd.f32 %v3129_v31, %v962_v50  ;;  %v3936_v12 = vpop.permute.xlu1 %2013  ;;  %v3938_v11 = vpop.permute.xlu0 %2021 }
 0x3e3   : > { %4773 = vst [vmem:[#allocation48_spill] sm:$0xff] %v3936_v12  ;;  %4774 = vst [vmem:[#allocation49_spill] sm:$0xff] %v3938_v11  ;;  %v3192_v6 = vpop.f32.mrf.mxu0 }
 0x3e4   : > { %v987_v3 = vsub.f32 0.0, %v983_v29  ;;  %v981_v1 = vand.u32 2147483647, %v3934_v20  ;;  %v3941_v63 = vadd.f32 %v3192_v6, %v3129_v31 }
 0x3e5   : > { %v965_v61 = vpop.f32.mrf.mxu0 }
 0x3e6   : > { %v993_v56 = vmul.f32 1.442695, %v987_v3  ;;  %v985_v52 = vsub.f32 0.0, %v981_v1  ;;  %v984_v38 = vand.u32 2147483647, %v3941_v63  ;;  %v3944_v35 = vpop.permute.xlu1 %2025  ;;  %v3946_v32 = vpop.permute.xlu0 %2033  ;;  %v3948_v50 = vadd.f32 %v3129_v31, %v965_v61 }
 0x3e7   : > { %4775 = vst [vmem:[#allocation50_spill] sm:$0xff] %v3944_v35  ;;  %4776 = vst [vmem:[#allocation51_spill] sm:$0xff] %v3946_v32 }
 0x3e8   : > { %4777 = vst [vmem:[#allocation52_spill] sm:$0xff] %v3948_v50  ;;  %3288 = vpow2.f32 %v993_v56  ;;  %v989_v12 = vmul.f32 1.442695, %v985_v52  ;;  %v988_v11 = vsub.f32 0.0, %v984_v38  ;;  %v982_v3 = vand.u32 2147483647, %v3948_v50 }
 0x3ea   : > { %3290 = vpow2.f32 %v989_v12  ;;  %v995_v29 = vmul.f32 1.442695, %v988_v11  ;;  %v3950_v30 = vpop.permute.xlu1 %2037  ;;  %v3952_v6 = vpop.permute.xlu0 %1757  ;;  %v986_v35 = vsub.f32 0.0, %v982_v3 }
 0x3eb   : > { %4778 = vst [vmem:[#allocation53_spill] sm:$0xff] %v3950_v30  ;;  %4779 = vst [vmem:[#allocation54_spill] sm:$0xff] %v3952_v6 }
 0x3ec   : > { %3292 = vpow2.f32 %v995_v29  ;;  %v991_v52 = vmul.f32 1.442695, %v986_v35 }
 0x3ee   : > { %v2538_v1 = vpop.permute.xlu1 %2537  ;;  %v3955_v42 = vpop.permute.xlu0 %1769  ;;  %3294 = vpow2.f32 %v991_v52 }
 0x3ef   : > { %4780 = vst [vmem:[#allocation55_spill] sm:$0xff] %v3955_v42  ;;  %2549 = vst.msk [vmem:[#allocation6 + $0x8] sm:$0xff] %vm2547_vm11, %v2538_v1 }
 0x3f2   : > { %v3958_v61 = vpop.permute.xlu1 %1761  ;;  %v3960_v56 = vpop.permute.xlu0 %1781 }
 0x3f3   : > { %4781 = vst [vmem:[#allocation56_spill] sm:$0xff] %v3958_v61  ;;  %4782 = vst [vmem:[#allocation57_spill] sm:$0xff] %v3960_v56 }
 0x3f5   : > { %v3289_v12 = vpop.eup %3288 }
 0x3f6   : > { %v1015_v11 = vadd.f32 1.0, %v3289_v12  ;;  %v3962_v31 = vpop.permute.xlu1 %1773  ;;  %v3964_v38 = vpop.permute.xlu0 %1793  ;;  %v1018_v56 = vmul.f32 -0.5, %v3289_v12  ;;  %v1021_v26 = vand.u32 2147483647, %v3289_v12 }
 0x3f7   : > { %4783 = vst [vmem:[#allocation58_spill] sm:$0xff] %v3962_v31  ;;  %4784 = vst [vmem:[#allocation59_spill] sm:$0xff] %v3964_v38  ;;  %v3291_v30 = vpop.eup %3290  ;;  %v3502_v31 = vmov 1966171168  }
 0x3f8   : > { %3296 = vlog2.f32 %v1015_v11  ;;  %v997_v29 = vadd.f32 1.0, %v3291_v30  ;;  %v1045_v6 = vunpack.c.l.s4 %v3502_v31  ;;  %v1000_v38 = vmul.f32 -0.5, %v3291_v30 }
 0x3f9   : > { %v3293_v32 = vpop.eup %3292  ;;  %v1019_v28 = vadd.f32 1.0, %v1018_v56  ;;  %vm1022_vm12 = vcmp.lt.f32.partialorder %v1021_v26, 0.0004427343 }
 0x3fa   : > { %3298 = vlog2.f32 %v997_v29  ;;  %v1024_v3 = vadd.f32 1.0, %v3293_v32  ;;  %v3966_v42 = vpop.permute.xlu1 %1785  ;;  %v3968_v1 = vpop.permute.xlu0 %1805  ;;  %v1027_v52 = vmul.f32 -0.5, %v3293_v32  ;;  %v1046_v29 = vunpack.c.0.s8 %v1045_v6 }
 0x3fb   : > { %4785 = vst [vmem:[#allocation60_spill] sm:$0xff] %v3966_v42  ;;  %4786 = vst [vmem:[#allocation61_spill] sm:$0xff] %v3968_v1  ;;  %v1001_v42 = vadd.f32 1.0, %v1000_v38  ;;  %v3978_v25 = vpop.eup %3294  ;;  %v1003_v1 = vand.u32 2147483647, %v3291_v30  ;;  %v979_v6 = vmax.f32 %v3931_v45, 0.0 }
 0x3fc   : > { %3300 = vlog2.f32 %v1024_v3  ;;  %4791 = vst [vmem:[#allocation66_spill] sm:$0xff] %v3978_v25  ;;  %v1028_v23 = vadd.f32 1.0, %v1027_v52  ;;  %v1006_v50 = vadd.f32 1.0, %v3978_v25 }
 0x3fd   : > { %v1002_v38 = vmul.f32 %v3291_v30, %v1001_v42  ;;  %vm1004_vm13 = vcmp.lt.f32.partialorder %v1003_v1, 0.0004427343 }
 0x3fe   : > { %v3970_v35 = vpop.permute.xlu1 %1797  ;;  %v3972_v61 = vpop.permute.xlu0 %1817  ;;  %3302 = vlog2.f32 %v1006_v50 }
 0x3ff   : > { %4787 = vst [vmem:[#allocation62_spill] sm:$0xff] %v3970_v35  ;;  %4788 = vst [vmem:[#allocation63_spill] sm:$0xff] %v3972_v61  ;;  %v1020_v35 = vmul.f32 %v3289_v12, %v1019_v28  ;;  %v1030_v61 = vand.u32 2147483647, %v3293_v32  ;;  %v1009_v28 = vmul.f32 -0.5, %v3978_v25 }
 0x401   : > { %vm3996_vm14 = vcmp.lt.f32.partialorder %v1030_v61, 0.0004427343 }
 0x402   : > { %v3974_v11 = vpop.permute.xlu1 %1809  ;;  %v3976_v27 = vpop.permute.xlu0 %1829 }
 0x403   : > { %4789 = vst [vmem:[#allocation64_spill] sm:$0xff] %v3974_v11  ;;  %4790 = vst [vmem:[#allocation65_spill] sm:$0xff] %v3976_v27  ;;  %v3985_v11 = vsub.s32 %v1046_v29, %v3641_v5  ;;  %v3994_v29 = vmul.f32 %v3293_v32, %v1028_v23  ;;  %v4011_v23 = vadd.f32 1.0, %v1009_v28 }
 0x405   : > { %v3297_v3 = vpop.eup %3296  ;;  %4797 = vst [vmem:[#allocation70_spill] sm:$0xff] %v4011_v23 }
 0x406   : > { %v1017_v24 = vmul.f32 0.6931472, %v3297_v3  ;;  %v3980_v22 = vpop.permute.xlu1 %1821  ;;  %v3982_v31 = vpop.permute.xlu0 %1841  ;;  %v977_v3 = vmax.f32 %v3934_v20, 0.0 }
 0x407   : > { %4792 = vst [vmem:[#allocation67_spill] sm:$0xff] %v3980_v22  ;;  %4793 = vst [vmem:[#allocation68_spill] sm:$0xff] %v3982_v31  ;;  %v3299_v56 = vpop.eup %3298 }
 0x408   : > { %v1023_v27 = vsel %vm1022_vm12, %v1020_v35, %v1017_v24  ;;  %v999_v21 = vmul.f32 0.6931472, %v3299_v56 }
 0x409   : > { %v3301_v12 = vpop.eup %3300  ;;  %v1035_v52 = vadd.f32 %v1023_v27, %v979_v6 }
 0x40a   : > { %v1005_v22 = vsel %vm1004_vm13, %v1002_v38, %v999_v21  ;;  %v3992_v5 = vmul.f32 0.6931472, %v3301_v12  ;;  %v4000_v24 = vpop.permute.xlu1 %1833  ;;  %v2540_v26 = vpop.permute.xlu0 %2539  ;;  %v4034_v12 = vld [vmem:[%s4706_s9] sm:$0xff] }
 0x40b   : > { %4796 = vst [vmem:[#allocation69_spill] sm:$0xff] %v4000_v24  ;;  %v1141_v30 = vcombine.high %v1035_v52, %v1035_v52  ;;  %v1148_v27 = vrot.slane %v1035_v52, %v3985_v11  ;;  %v2041_v20 = vmul.f32 %v1035_v52, %v3732_v43  ;;  %v4004_v45 = vadd.f32 %v1005_v22, %v977_v3  ;;  %v4039_v52 = vld [vmem:[%s4706_s9 + $0x8] sm:$0xff]  ;;  %v4076_v10 = vpop.eup %3302 }
 0x40c   : > { %2550 = vst.msk [vmem:[#allocation6 + $0x10] sm:$0xff] %vm2547_vm11, %v2540_v26 }
 0x40d   : > { %v1155_v61 = vrot.slane %v1141_v30, %v3985_v11  ;;  %v1156_v1 = vcombine.high %v1148_v27, %v1148_v27  ;;  %v1164_v35 = vrot.slane %v1148_v27, %v3985_v11  ;;  %v2145_v56 = vcombine.high %v2041_v20, %v2041_v20 }
 0x40e   : > { %v4017_v22 = vrot.slane %v2041_v20, %v3985_v11  ;;  %v4023_v38 = vrot.slane %v4004_v45, %v3985_v11  ;;  %v4027_v50 = vmul.f32 %v4004_v45, %v3728_v39  ;;  %v4029_v28 = vpop.permute.xlu1 %1845 }
 0x40f   : > { %4798 = vst [vmem:[#allocation71_spill] sm:$0xff] %v4029_v28  ;;  %v1157_v3 = vcombine.high %v1155_v61, %v1155_v61  ;;  %v1171_v26 = vrot.slane %v1155_v61, %v3985_v11  ;;  %v1178_v30 = vrot.slane %v1156_v1, %v3985_v11  ;;  %v1186_v27 = vcombine.high %v1164_v35, %v1164_v35 }
 0x410   : > { %v1306_v20 = vrot.slane %v1164_v35, %v3746_v49  ;;  %v2159_v32 = vrot.slane %v2145_v56, %v3985_v11  ;;  %v2160_v21 = vcombine.high %v4017_v22, %v4017_v22  ;;  %v4049_v31 = vrot.slane %v4017_v22, %v3985_v11 }
 0x411   : > { %v1185_v6 = vrot.slane %v1157_v3, %v3985_v11  ;;  %v1187_v39 = vcombine.high %v1171_v26, %v1171_v26  ;;  %v1188_v43 = vcombine.high %v1178_v30, %v1178_v30  ;;  %v1310_v61 = vrot.slane %v1178_v30, %v3746_v49 }
 0x412   : > { %v1314_v1 = vrot.slane %v1186_v27, %v3746_v49  ;;  %v1322_v28 = vrot.slane %v1171_v26, %v3746_v49  ;;  %v1431_v35 = vmul.f32 %v1306_v20, %v4034_v12  ;;  %v1432_v56 = vmul.f32 %v1306_v20, %v4039_v52  ;;  %v2542_v24 = vpop.permute.xlu1 %2541 }
 0x413   : > { %v1189_v23 = vcombine.high %v1185_v6, %v1185_v6  ;;  %v1318_v25 = vrot.slane %v1188_v43, %v3746_v49  ;;  %v1326_v22 = vrot.slane %v1185_v6, %v3746_v49  ;;  %v1330_v3 = vrot.slane %v1187_v39, %v3746_v49  ;;  %2551 = vst.msk [vmem:[#allocation6 + $0x18] sm:$0xff] %vm2547_vm11, %v2542_v24 }
 0x414   : > { %v1433_v30 = vmul.f32 %v1310_v61, %v4034_v12  ;;  %v1434_v27 = vmul.f32 %v1310_v61, %v4039_v52  ;;  %v1435_v26 = vmul.f32 %v1314_v1, %v4034_v12  ;;  %v1436_v44 = vmul.f32 %v1314_v1, %v4039_v52 }
 0x415   : > { %v1334_v20 = vrot.slane %v1189_v23, %v3746_v49  ;;  %v1437_v19 = vmul.f32 %v1318_v25, %v4034_v12  ;;  %v1438_v43 = vmul.f32 %v1318_v25, %v4039_v52  ;;  %v1439_v6 = vmul.f32 %v1322_v28, %v4034_v12 }
 0x416   : > { %v1440_v39 = vmul.f32 %v1322_v28, %v4039_v52  ;;  %v1441_v24 = vmul.f32 %v1326_v22, %v4034_v12  ;;  %v1442_v18 = vmul.f32 %v1326_v22, %v4039_v52  ;;  %v1443_v61 = vmul.f32 %v1330_v3, %v4034_v12 }
 0x417   : > { %v1444_v17 = vmul.f32 %v1330_v3, %v4039_v52  ;;  %v1445_v1 = vmul.f32 %v1334_v20, %v4034_v12  ;;  %v1446_v23 = vmul.f32 %v1334_v20, %v4039_v52  ;;  %v1527_v16 = vmul.f32 1.442695, %v1431_v35 }
 0x418   : > { %v1529_v15 = vmul.f32 1.442695, %v1432_v56  ;;  %v1531_v14 = vmul.f32 1.442695, %v1433_v30  ;;  %v1533_v25 = vmul.f32 1.442695, %v1434_v27  ;;  %v2161_v13 = vcombine.high %v2159_v32, %v2159_v32 }
 0x419   : > { %3304 = vpow2.f32 %v1527_v16  ;;  %v1535_v28 = vmul.f32 1.442695, %v1435_v26  ;;  %v1537_v9 = vmul.f32 1.442695, %v1436_v44  ;;  %v1539_v8 = vmul.f32 1.442695, %v1437_v19 }
 0x41a   : > { %3306 = vpow2.f32 %v1529_v15  ;;  %v1541_v22 = vmul.f32 1.442695, %v1438_v43  ;;  %v1543_v7 = vmul.f32 1.442695, %v1439_v6  ;;  %v1545_v54 = vmul.f32 1.442695, %v1440_v39 }
 0x41b   : > { %3308 = vpow2.f32 %v1531_v14  ;;  %v1547_v3 = vmul.f32 1.442695, %v1441_v24  ;;  %v1549_v4 = vmul.f32 1.442695, %v1442_v18  ;;  %v1551_v0 = vmul.f32 1.442695, %v1443_v61 }
 0x41c   : > { %3310 = vpow2.f32 %v1533_v25  ;;  %v1553_v35 = vmul.f32 1.442695, %v1444_v17  ;;  %v1555_v56 = vmul.f32 1.442695, %v1445_v1  ;;  %v1557_v30 = vmul.f32 1.442695, %v1446_v23 }
 0x41d   : > { %3312 = vpow2.f32 %v1535_v28  ;;  %v2175_v27 = vrot.slane %v2159_v32, %v3985_v11  ;;  %v2182_v16 = vrot.slane %v2160_v21, %v3985_v11  ;;  %v2189_v44 = vrot.slane %v2161_v13, %v3985_v11 }
 0x41e   : > { %3314 = vpow2.f32 %v1537_v9  ;;  %v2190_v15 = vcombine.high %v4049_v31, %v4049_v31  ;;  %v2310_v14 = vrot.slane %v4049_v31, %v3746_v49  ;;  %v4799_v17 = vcombine.high %v4004_v45, %v4004_v45 }
 0x41f   : > { %3316 = vpow2.f32 %v1539_v8  ;;  %v2191_v19 = vcombine.high %v2175_v27, %v2175_v27  ;;  %v2192_v32 = vcombine.high %v2182_v16, %v2182_v16  ;;  %v2193_v26 = vcombine.high %v2189_v44, %v2189_v44 }
 0x420   : > { %v4089_v18 = vrot.slane %v4799_v17, %v3985_v11  ;;  %3318 = vpow2.f32 %v1541_v22  ;;  %v2314_v13 = vrot.slane %v2182_v16, %v3746_v49  ;;  %v2318_v9 = vrot.slane %v2190_v15, %v3746_v49 }
 0x421   : > { %v2326_v21 = vrot.slane %v2175_v27, %v3746_v49  ;;  %3320 = vpow2.f32 %v1543_v7  ;;  %v2322_v31 = vrot.slane %v2192_v32, %v3746_v49  ;;  %v2330_v20 = vrot.slane %v2189_v44, %v3746_v49 }
 0x422   : > { %v2334_v45 = vrot.slane %v2191_v19, %v3746_v49  ;;  %3322 = vpow2.f32 %v1545_v54  ;;  %v2338_v8 = vrot.slane %v2193_v26, %v3746_v49  ;;  %v2435_v43 = vmul.f32 %v2310_v14, %v3833_v34 }
 0x423   : > { %v2436_v6 = vmul.f32 %v2310_v14, %v3831_v33  ;;  %3324 = vpow2.f32 %v1547_v3  ;;  %v2437_v39 = vmul.f32 %v2314_v13, %v3839_v37  ;;  %v2438_v24 = vmul.f32 %v2314_v13, %v3837_v36 }
 0x424   : > { %v2439_v7 = vmul.f32 %v2318_v9, %v3845_v41  ;;  %3326 = vpow2.f32 %v1549_v4  ;;  %v2440_v61 = vmul.f32 %v2318_v9, %v3843_v40  ;;  %v2441_v1 = vmul.f32 %v2322_v31, %v3851_v47  ;;  %2499 = vst.msk [vmem:[#allocation5 + $0x100] sm:$0xff] %vm774_vm2, %v2435_v43 }
 0x425   : > { %v2442_v54 = vmul.f32 %v2322_v31, %v3849_v46  ;;  %2500 = vst.msk [vmem:[#allocation5 + $0x108] sm:$0xff] %vm774_vm2, %v2436_v6  ;;  %3328 = vpow2.f32 %v1551_v0  ;;  %v2443_v33 = vmul.f32 %v2326_v21, %v3857_v51  ;;  %v2444_v34 = vmul.f32 %v2326_v21, %v3855_v48  ;;  %2501 = vst.msk [vmem:[#allocation5 + $0x110] sm:$0xff] %vm774_vm2, %v2437_v39 }
 0x426   : > { %v2445_v36 = vmul.f32 %v2330_v20, %v3861_v55  ;;  %2502 = vst.msk [vmem:[#allocation5 + $0x118] sm:$0xff] %vm774_vm2, %v2438_v24  ;;  %2503 = vst.msk [vmem:[#allocation5 + $0x120] sm:$0xff] %vm774_vm2, %v2439_v7  ;;  %v3305_v37 = vpop.eup %3304  ;;  %3330 = vpow2.f32 %v1553_v35  ;;  %v2446_v40 = vmul.f32 %v2330_v20, %v3859_v53  ;;  %v2447_v41 = vmul.f32 %v2334_v45, %v3867_v58 }
 0x427   : > { %v2448_v46 = vmul.f32 %v2334_v45, %v3865_v57  ;;  %2504 = vst.msk [vmem:[#allocation5 + $0x128] sm:$0xff] %vm774_vm2, %v2440_v61  ;;  %2505 = vst.msk [vmem:[#allocation5 + $0x130] sm:$0xff] %vm774_vm2, %v2441_v1  ;;  %v3307_v47 = vpop.eup %3306  ;;  %3332 = vpow2.f32 %v1555_v56  ;;  %v2449_v48 = vmul.f32 %v2338_v8, %v3871_v60  ;;  %v2450_v51 = vmul.f32 %v2338_v8, %v3869_v59 }
 0x428   : > { %2506 = vst.msk [vmem:[#allocation5 + $0x138] sm:$0xff] %vm774_vm2, %v2442_v54  ;;  %1623 = vst.msk [vmem:[#allocation4 + $0x100] sm:$0xff] %vm774_vm2, %v3305_v37  ;;  %v1058_v53 = vcombine.high %v4023_v38, %v4023_v38  ;;  %v3309_v55 = vpop.eup %3308  ;;  %3334 = vpow2.f32 %v1557_v30  ;;  %v1059_v57 = vcombine.high %v4089_v18, %v4089_v18  ;;  %v1066_v58 = vrot.slane %v4023_v38, %v3985_v11 }
 0x429   : > { %2507 = vst.msk [vmem:[#allocation5 + $0x140] sm:$0xff] %vm774_vm2, %v2443_v33  ;;  %2508 = vst.msk [vmem:[#allocation5 + $0x148] sm:$0xff] %vm774_vm2, %v2444_v34  ;;  %v1073_v59 = vrot.slane %v4089_v18, %v3985_v11  ;;  %v3311_v60 = vpop.eup %3310  ;;  %v2047_v4 = vcombine.high %v4027_v50, %v4027_v50  ;;  %v4146_v23 = vrot.slane %v4027_v50, %v3985_v11  ;;  %v4800_v38 = vmax.f32 %v3941_v63, 0.0 }
 0x42a   : > { %2509 = vst.msk [vmem:[#allocation5 + $0x150] sm:$0xff] %vm774_vm2, %v2445_v36  ;;  %1624 = vst.msk [vmem:[#allocation4 + $0x108] sm:$0xff] %vm774_vm2, %v3307_v47  ;;  %v1080_v0 = vrot.slane %v1058_v53, %v3985_v11  ;;  %v4801_v25 = vsel %vm3996_vm14, %v3994_v29, %v3992_v5  ;;  %v3313_v22 = vpop.eup %3312  ;;  %v1087_v3 = vrot.slane %v1059_v57, %v3985_v11 }
 0x42b   : > { %2510 = vst.msk [vmem:[#allocation5 + $0x158] sm:$0xff] %vm774_vm2, %v2446_v40  ;;  %2511 = vst.msk [vmem:[#allocation5 + $0x160] sm:$0xff] %vm774_vm2, %v2447_v41  ;;  %v4155_v28 = vadd.f32 %v4801_v25, %v4800_v38  ;;  %v1088_v35 = vcombine.high %v1066_v58, %v1066_v58  ;;  %v1089_v56 = vcombine.high %v1073_v59, %v1073_v59  ;;  %v3315_v50 = vpop.eup %3314 }
 0x42c   : > { %2512 = vst.msk [vmem:[#allocation5 + $0x168] sm:$0xff] %vm774_vm2, %v2448_v46  ;;  %1625 = vst.msk [vmem:[#allocation4 + $0x110] sm:$0xff] %vm774_vm2, %v3309_v55  ;;  %v1242_v30 = vrot.slane %v1066_v58, %v3746_v49  ;;  %v1090_v63 = vcombine.high %v1080_v0, %v1080_v0  ;;  %v1246_v42 = vrot.slane %v1080_v0, %v3746_v49  ;;  %v3317_v29 = vpop.eup %3316 }
 0x42d   : > { %2513 = vst.msk [vmem:[#allocation5 + $0x170] sm:$0xff] %vm774_vm2, %v2449_v48  ;;  %2514 = vst.msk [vmem:[#allocation5 + $0x178] sm:$0xff] %vm774_vm2, %v2450_v51  ;;  %v1258_v27 = vrot.slane %v1073_v59, %v3746_v49  ;;  %v4164_v5 = vrot.slane %v2047_v4, %v3985_v11  ;;  %v1091_v16 = vcombine.high %v1087_v3, %v1087_v3  ;;  %v3319_v17 = vpop.eup %3318 }
 0x42e   : > { %1626 = vst.msk [vmem:[#allocation4 + $0x118] sm:$0xff] %vm774_vm2, %v3311_v60  ;;  %1627 = vst.msk [vmem:[#allocation4 + $0x120] sm:$0xff] %vm774_vm2, %v3313_v22  ;;  %v1250_v44 = vrot.slane %v1088_v35, %v3746_v49  ;;  %v1262_v15 = vrot.slane %v1087_v3, %v3746_v49  ;;  %v1266_v14 = vrot.slane %v1089_v56, %v3746_v49  ;;  %v3321_v13 = vpop.eup %3320 }
 0x42f   : > { %1628 = vst.msk [vmem:[#allocation4 + $0x128] sm:$0xff] %vm774_vm2, %v3315_v50  ;;  %1629 = vst.msk [vmem:[#allocation4 + $0x130] sm:$0xff] %vm774_vm2, %v3317_v29  ;;  %v1254_v18 = vrot.slane %v1090_v63, %v3746_v49  ;;  %v1399_v19 = vmul.f32 %v1242_v30, %v4034_v12  ;;  %v1400_v32 = vmul.f32 %v1242_v30, %v4039_v52  ;;  %v3323_v45 = vpop.eup %3322 }
 0x430   : > { %v1401_v26 = vmul.f32 %v1246_v42, %v4034_v12  ;;  %1630 = vst.msk [vmem:[#allocation4 + $0x138] sm:$0xff] %vm774_vm2, %v3319_v17  ;;  %v1270_v9 = vrot.slane %v1091_v16, %v3746_v49  ;;  %v1402_v21 = vmul.f32 %v1246_v42, %v4039_v52  ;;  %v1403_v31 = vmul.f32 %v1250_v44, %v4034_v12  ;;  %v3325_v24 = vpop.eup %3324 }
 0x431   : > { %v1404_v20 = vmul.f32 %v1250_v44, %v4039_v52  ;;  %1631 = vst.msk [vmem:[#allocation4 + $0x140] sm:$0xff] %vm774_vm2, %v3321_v13  ;;  %v1405_v8 = vmul.f32 %v1254_v18, %v4034_v12  ;;  %v1406_v43 = vmul.f32 %v1254_v18, %v4039_v52  ;;  %v1407_v6 = vmul.f32 %v1258_v27, %v4034_v12  ;;  %v3327_v33 = vpop.eup %3326 }
 0x432   : > { %v1408_v39 = vmul.f32 %v1258_v27, %v4039_v52  ;;  %1632 = vst.msk [vmem:[#allocation4 + $0x148] sm:$0xff] %vm774_vm2, %v3323_v45  ;;  %v1409_v7 = vmul.f32 %v1262_v15, %v4034_v12  ;;  %v1410_v61 = vmul.f32 %v1262_v15, %v4039_v52  ;;  %v1411_v1 = vmul.f32 %v1266_v14, %v4034_v12  ;;  %v3329_v41 = vpop.eup %3328 }
 0x433   : > { %v1412_v54 = vmul.f32 %v1266_v14, %v4039_v52  ;;  %1633 = vst.msk [vmem:[#allocation4 + $0x150] sm:$0xff] %vm774_vm2, %v3325_v24  ;;  %v1413_v34 = vmul.f32 %v1270_v9, %v4034_v12  ;;  %v1414_v36 = vmul.f32 %v1270_v9, %v4039_v52  ;;  %v1463_v37 = vmul.f32 1.442695, %v1399_v19  ;;  %1634 = vst.msk [vmem:[#allocation4 + $0x158] sm:$0xff] %vm774_vm2, %v3327_v33  ;;  %v3331_v53 = vpop.eup %3330  ;;  %v4805_v24 = vld [vmem:[#allocation26_spill] sm:$0xff] }
 0x434   : > { %v1465_v40 = vmul.f32 1.442695, %v1400_v32  ;;  %v1467_v46 = vmul.f32 1.442695, %v1401_v26  ;;  %v1469_v47 = vmul.f32 1.442695, %v1402_v21  ;;  %v2062_v51 = vcombine.high %v4146_v23, %v4146_v23  ;;  %v3333_v59 = vpop.eup %3332 }
 0x435   : > { %v1471_v48 = vmul.f32 1.442695, %v1403_v31  ;;  %1635 = vst.msk [vmem:[#allocation4 + $0x160] sm:$0xff] %vm774_vm2, %v3329_v41  ;;  %3336 = vpow2.f32 %v1463_v37  ;;  %v1473_v55 = vmul.f32 1.442695, %v1404_v20  ;;  %1636 = vst.msk [vmem:[#allocation4 + $0x168] sm:$0xff] %vm774_vm2, %v3331_v53  ;;  %v3335_v38 = vpop.eup %3334  ;;  %v2063_v30 = vcombine.high %v4164_v5, %v4164_v5 }
 0x436   : > { %v1475_v57 = vmul.f32 1.442695, %v1405_v8  ;;  %v1477_v58 = vmul.f32 1.442695, %v1406_v43  ;;  %3338 = vpow2.f32 %v1465_v40  ;;  %v1479_v60 = vmul.f32 1.442695, %v1407_v6 }
 0x437   : > { %v1481_v0 = vmul.f32 1.442695, %v1408_v39  ;;  %v1483_v4 = vmul.f32 1.442695, %v1409_v7  ;;  %1637 = vst.msk [vmem:[#allocation4 + $0x170] sm:$0xff] %vm774_vm2, %v3333_v59  ;;  %3340 = vpow2.f32 %v1467_v46  ;;  %1638 = vst.msk [vmem:[#allocation4 + $0x178] sm:$0xff] %vm774_vm2, %v3335_v38  ;;  %v2070_v50 = vrot.slane %v4146_v23, %v3985_v11 }
 0x438   : > { %v1485_v25 = vmul.f32 1.442695, %v1410_v61  ;;  %v1487_v22 = vmul.f32 1.442695, %v1411_v1  ;;  %v1489_v3 = vmul.f32 1.442695, %v1412_v54  ;;  %3342 = vpow2.f32 %v1469_v47 }
 0x439   : > { %v1491_v35 = vmul.f32 1.442695, %v1413_v34  ;;  %v1493_v56 = vmul.f32 1.442695, %v1414_v36  ;;  %3344 = vpow2.f32 %v1471_v48  ;;  %v2077_v63 = vrot.slane %v4164_v5, %v3985_v11  ;;  %v4802_v20 = vld [vmem:[#allocation23_spill] sm:$0xff]  ;;  %v4803_v8 = vld [vmem:[#allocation24_spill] sm:$0xff] }
 0x43a   : > { %v2084_v42 = vrot.slane %v2062_v51, %v3985_v11  ;;  %3346 = vpow2.f32 %v1473_v55  ;;  %v2091_v27 = vrot.slane %v2063_v30, %v3985_v11  ;;  %v1190_v29 = vcombine.high %v4155_v28, %v4155_v28  ;;  %v4804_v6 = vld [vmem:[#allocation25_spill] sm:$0xff]  ;;  %v4806_v61 = vld [vmem:[#allocation27_spill] sm:$0xff]  ;;  %v4807_v54 = vld [vmem:[#allocation28_spill] sm:$0xff] }
 0x43b   : > { %v4212_v16 = vrot.slane %v4155_v28, %v3985_v11  ;;  %3348 = vpow2.f32 %v1475_v57  ;;  %v2092_v44 = vcombine.high %v2070_v50, %v2070_v50  ;;  %v2093_v15 = vcombine.high %v2077_v63, %v2077_v63  ;;  %v4808_v34 = vld [vmem:[#allocation29_spill] sm:$0xff]  ;;  %v4810_v40 = vld [vmem:[#allocation31_spill] sm:$0xff]  ;;  %v4811_v46 = vld [vmem:[#allocation32_spill] sm:$0xff] }
 0x43c   : > { %v2094_v14 = vcombine.high %v2084_v42, %v2084_v42  ;;  %3350 = vpow2.f32 %v1477_v58  ;;  %v2095_v23 = vcombine.high %v2091_v27, %v2091_v27  ;;  %v2246_v5 = vrot.slane %v2070_v50, %v3746_v49  ;;  %v4812_v51 = vld [vmem:[#allocation33_spill] sm:$0xff]  ;;  %v4813_v55 = vld [vmem:[#allocation34_spill] sm:$0xff]  ;;  %v4814_v58 = vld [vmem:[#allocation35_spill] sm:$0xff] }
 0x43d   : > { %v2250_v17 = vrot.slane %v2084_v42, %v3746_v49  ;;  %3352 = vpow2.f32 %v1479_v60  ;;  %v2254_v18 = vrot.slane %v2092_v44, %v3746_v49  ;;  %v2262_v32 = vrot.slane %v2077_v63, %v3746_v49  ;;  %v4817_v30 = vld [vmem:[#allocation52_spill] sm:$0xff]  ;;  %v4818_v44 = vld [vmem:[#allocation66_spill] sm:$0xff] }
 0x43e   : > { %v2258_v19 = vrot.slane %v2094_v14, %v3746_v49  ;;  %3354 = vpow2.f32 %v1481_v0  ;;  %v2266_v26 = vrot.slane %v2091_v27, %v3746_v49  ;;  %v2270_v13 = vrot.slane %v2093_v15, %v3746_v49  ;;  %v4815_v0 = vld [vmem:[#allocation36_spill] sm:$0xff] }
 0x43f   : > { %v2274_v9 = vrot.slane %v2095_v23, %v3746_v49  ;;  %3356 = vpow2.f32 %v1483_v4  ;;  %v2403_v21 = vmul.f32 %v2246_v5, %v3878_v2  ;;  %v2404_v31 = vmul.f32 %v2246_v5, %v3873_v62  ;;  %v4809_v2 = vld [vmem:[#allocation30_spill] sm:$0xff] }
 0x440   : > { %v2405_v45 = vmul.f32 %v2250_v17, %v4802_v20  ;;  %3358 = vpow2.f32 %v1485_v25  ;;  %v2406_v43 = vmul.f32 %v2250_v17, %v4803_v8  ;;  %v2407_v39 = vmul.f32 %v2254_v18, %v4804_v6  ;;  %v4822_v17 = vld [vmem:[#allocation70_spill] sm:$0xff] }
 0x441   : > { %v2408_v7 = vmul.f32 %v2254_v18, %v4805_v24  ;;  %3360 = vpow2.f32 %v1487_v22  ;;  %v2409_v1 = vmul.f32 %v2258_v19, %v4806_v61  ;;  %v2410_v33 = vmul.f32 %v2258_v19, %v4807_v54  ;;  %2467 = vst.msk [vmem:[#allocation5] sm:$0xff] %vm774_vm2, %v2403_v21  ;;  %2468 = vst.msk [vmem:[#allocation5 + $0x8] sm:$0xff] %vm774_vm2, %v2404_v31 }
 0x442   : > { %v2411_v36 = vmul.f32 %v2262_v32, %v4808_v34  ;;  %2469 = vst.msk [vmem:[#allocation5 + $0x10] sm:$0xff] %vm774_vm2, %v2405_v45  ;;  %v3337_v62 = vpop.eup %3336  ;;  %3362 = vpow2.f32 %v1489_v3  ;;  %v2412_v37 = vmul.f32 %v2262_v32, %v4809_v2  ;;  %v2413_v41 = vmul.f32 %v2266_v26, %v4810_v40  ;;  %2470 = vst.msk [vmem:[#allocation5 + $0x18] sm:$0xff] %vm774_vm2, %v2406_v43 }
 0x443   : > { %v2414_v47 = vmul.f32 %v2266_v26, %v4811_v46  ;;  %2471 = vst.msk [vmem:[#allocation5 + $0x20] sm:$0xff] %vm774_vm2, %v2407_v39  ;;  %2472 = vst.msk [vmem:[#allocation5 + $0x28] sm:$0xff] %vm774_vm2, %v2408_v7  ;;  %v3339_v48 = vpop.eup %3338  ;;  %3364 = vpow2.f32 %v1491_v35  ;;  %v2415_v53 = vmul.f32 %v2270_v13, %v4812_v51  ;;  %v2416_v57 = vmul.f32 %v2270_v13, %v4813_v55  ;;  %v4816_v35 = vld [vmem:[#allocation15_spill] sm:$0xff] }
 0x444   : > { %1591 = vst.msk [vmem:[#allocation4] sm:$0xff] %vm774_vm2, %v3337_v62  ;;  %v2417_v59 = vmul.f32 %v2274_v9, %v4814_v58  ;;  %2473 = vst.msk [vmem:[#allocation5 + $0x30] sm:$0xff] %vm774_vm2, %v2409_v1  ;;  %v3341_v60 = vpop.eup %3340  ;;  %3366 = vpow2.f32 %v1493_v56  ;;  %v2418_v4 = vmul.f32 %v2274_v9, %v4815_v0  ;;  %v1204_v38 = vrot.slane %v1190_v29, %v3985_v11 }
 0x445   : > { %2474 = vst.msk [vmem:[#allocation5 + $0x38] sm:$0xff] %vm774_vm2, %v2410_v33  ;;  %2475 = vst.msk [vmem:[#allocation5 + $0x40] sm:$0xff] %vm774_vm2, %v2411_v36  ;;  %v1205_v25 = vcombine.high %v4212_v16, %v4212_v16  ;;  %v3343_v22 = vpop.eup %3342  ;;  %v1213_v3 = vrot.slane %v4212_v16, %v3985_v11  ;;  %v4263_v56 = vmul.f32 %v4155_v28, %v4816_v35  ;;  %v978_v50 = vmax.f32 %v4817_v30, 0.0 }
 0x446   : > { %1592 = vst.msk [vmem:[#allocation4 + $0x8] sm:$0xff] %vm774_vm2, %v3339_v48  ;;  %2476 = vst.msk [vmem:[#allocation5 + $0x48] sm:$0xff] %vm774_vm2, %v2412_v37  ;;  %v3345_v63 = vpop.eup %3344  ;;  %v1206_v42 = vcombine.high %v1204_v38, %v1204_v38  ;;  %v1220_v27 = vrot.slane %v1204_v38, %v3985_v11  ;;  %v4819_v15 = vand.u32 2147483647, %v4818_v44  ;;  %v4279_v5 = vmul.f32 0.6931472, %v4076_v10 }
 0x447   : > { %2477 = vst.msk [vmem:[#allocation5 + $0x50] sm:$0xff] %vm774_vm2, %v2413_v41  ;;  %2478 = vst.msk [vmem:[#allocation5 + $0x58] sm:$0xff] %vm774_vm2, %v2414_v47  ;;  %v1227_v29 = vrot.slane %v1205_v25, %v3985_v11  ;;  %v3347_v28 = vpop.eup %3346  ;;  %v1235_v14 = vcombine.high %v1213_v3, %v1213_v3  ;;  %v1338_v23 = vrot.slane %v1213_v3, %v3746_v49 }
 0x448   : > { %1593 = vst.msk [vmem:[#allocation4 + $0x10] sm:$0xff] %vm774_vm2, %v3341_v60  ;;  %2479 = vst.msk [vmem:[#allocation5 + $0x60] sm:$0xff] %vm774_vm2, %v2415_v53  ;;  %vm4272_vm15 = vcmp.lt.f32.partialorder %v4819_v15, 0.0004427343  ;;  %v4283_v18 = vmul.f32 %v4818_v44, %v4822_v17  ;;  %v3349_v19 = vpop.eup %3348  ;;  %v1234_v32 = vrot.slane %v1206_v42, %v3985_v11  ;;  %v1236_v26 = vcombine.high %v1220_v27, %v1220_v27 }
 0x449   : > { %2480 = vst.msk [vmem:[#allocation5 + $0x68] sm:$0xff] %vm774_vm2, %v2416_v57  ;;  %2481 = vst.msk [vmem:[#allocation5 + $0x70] sm:$0xff] %vm774_vm2, %v2417_v59  ;;  %v1237_v13 = vcombine.high %v1227_v29, %v1227_v29  ;;  %v1342_v9 = vrot.slane %v1227_v29, %v3746_v49  ;;  %v3351_v21 = vpop.eup %3350  ;;  %v1346_v31 = vrot.slane %v1235_v14, %v3746_v49 }
 0x44a   : > { %1594 = vst.msk [vmem:[#allocation4 + $0x18] sm:$0xff] %vm774_vm2, %v3343_v22  ;;  %2482 = vst.msk [vmem:[#allocation5 + $0x78] sm:$0xff] %vm774_vm2, %v2418_v4  ;;  %v1354_v10 = vrot.slane %v1220_v27, %v3746_v49  ;;  %v1447_v20 = vmul.f32 %v1338_v23, %v4034_v12  ;;  %v2201_v45 = vrot.slane %v4263_v56, %v3985_v11  ;;  %v3353_v8 = vpop.eup %3352 }
 0x44b   : > { %1595 = vst.msk [vmem:[#allocation4 + $0x20] sm:$0xff] %vm774_vm2, %v3345_v63  ;;  %1596 = vst.msk [vmem:[#allocation4 + $0x28] sm:$0xff] %vm774_vm2, %v3347_v28  ;;  %v1238_v43 = vcombine.high %v1234_v32, %v1234_v32  ;;  %v1350_v6 = vrot.slane %v1237_v13, %v3746_v49  ;;  %v1358_v39 = vrot.slane %v1234_v32, %v3746_v49  ;;  %v3355_v7 = vpop.eup %3354 }
 0x44c   : > { %1597 = vst.msk [vmem:[#allocation4 + $0x30] sm:$0xff] %vm774_vm2, %v3349_v19  ;;  %1598 = vst.msk [vmem:[#allocation4 + $0x38] sm:$0xff] %vm774_vm2, %v3351_v21  ;;  %v1362_v24 = vrot.slane %v1236_v26, %v3746_v49  ;;  %v1448_v61 = vmul.f32 %v1338_v23, %v4039_v52  ;;  %v1449_v1 = vmul.f32 %v1342_v9, %v4034_v12  ;;  %v3357_v34 = vpop.eup %3356  ;;  %v1559_v58 = vmul.f32 1.442695, %v1447_v20 }
 0x44d   : > { %1599 = vst.msk [vmem:[#allocation4 + $0x40] sm:$0xff] %vm774_vm2, %v3353_v8  ;;  %v1450_v54 = vmul.f32 %v1342_v9, %v4039_v52  ;;  %v1014_v33 = vsel %vm4272_vm15, %v4283_v18, %v4279_v5  ;;  %1600 = vst.msk [vmem:[#allocation4 + $0x48] sm:$0xff] %vm774_vm2, %v3355_v7  ;;  %v1366_v36 = vrot.slane %v1238_v43, %v3746_v49  ;;  %v3359_v40 = vpop.eup %3358 }
 0x44e   : > { %v1451_v62 = vmul.f32 %v1346_v31, %v4034_v12  ;;  %v1452_v2 = vmul.f32 %v1346_v31, %v4039_v52  ;;  %v1453_v37 = vmul.f32 %v1350_v6, %v4034_v12  ;;  %1601 = vst.msk [vmem:[#allocation4 + $0x50] sm:$0xff] %vm774_vm2, %v3357_v34  ;;  %v1454_v41 = vmul.f32 %v1350_v6, %v4039_v52  ;;  %v3361_v51 = vpop.eup %3360  ;;  %v4825_v6 = vld [vmem:[#allocation39_spill] sm:$0xff] }
 0x44f   : > { %v1455_v46 = vmul.f32 %v1354_v10, %v4034_v12  ;;  %v1456_v47 = vmul.f32 %v1354_v10, %v4039_v52  ;;  %v1457_v48 = vmul.f32 %v1358_v39, %v4034_v12  ;;  %1602 = vst.msk [vmem:[#allocation4 + $0x58] sm:$0xff] %vm774_vm2, %v3359_v40  ;;  %v1458_v53 = vmul.f32 %v1358_v39, %v4039_v52  ;;  %v3363_v59 = vpop.eup %3362  ;;  %v4829_v34 = vld [vmem:[#allocation43_spill] sm:$0xff] }
 0x450   : > { %v1459_v55 = vmul.f32 %v1362_v24, %v4034_v12  ;;  %v1460_v57 = vmul.f32 %v1362_v24, %v4039_v52  ;;  %1603 = vst.msk [vmem:[#allocation4 + $0x60] sm:$0xff] %vm774_vm2, %v3361_v51  ;;  %v1461_v60 = vmul.f32 %v1366_v36, %v4034_v12  ;;  %v1561_v0 = vmul.f32 1.442695, %v1448_v61  ;;  %v3365_v25 = vpop.eup %3364  ;;  %1604 = vst.msk [vmem:[#allocation4 + $0x68] sm:$0xff] %vm774_vm2, %v3363_v59  ;;  %v4826_v24 = vld [vmem:[#allocation40_spill] sm:$0xff]  ;;  %v4827_v61 = vld [vmem:[#allocation41_spill] sm:$0xff] }
 0x451   : > { %v1563_v4 = vmul.f32 1.442695, %v1449_v1  ;;  %v1565_v38 = vmul.f32 1.442695, %v1450_v54  ;;  %v1462_v22 = vmul.f32 %v1366_v36, %v4039_v52  ;;  %3368 = vpow2.f32 %v1559_v58  ;;  %v3367_v63 = vpop.eup %3366  ;;  %1605 = vst.msk [vmem:[#allocation4 + $0x70] sm:$0xff] %vm774_vm2, %v3365_v25  ;;  %v4828_v54 = vld [vmem:[#allocation42_spill] sm:$0xff] }
 0x452   : > { %v1567_v3 = vmul.f32 1.442695, %v1451_v62  ;;  %v2209_v35 = vcombine.high %v2201_v45, %v2201_v45  ;;  %3370 = vpow2.f32 %v1561_v0  ;;  %v1569_v42 = vmul.f32 1.442695, %v1452_v2  ;;  %1606 = vst.msk [vmem:[#allocation4 + $0x78] sm:$0xff] %vm774_vm2, %v3367_v63  ;;  %v4830_v62 = vld [vmem:[#allocation44_spill] sm:$0xff] }
 0x453   : > { %v1571_v27 = vmul.f32 1.442695, %v1453_v37  ;;  %v1573_v29 = vmul.f32 1.442695, %v1454_v41  ;;  %3372 = vpow2.f32 %v1563_v4  ;;  %v1575_v44 = vmul.f32 1.442695, %v1455_v46 }
 0x454   : > { %v1577_v15 = vmul.f32 1.442695, %v1456_v47  ;;  %v1579_v16 = vmul.f32 1.442695, %v1457_v48  ;;  %3374 = vpow2.f32 %v1565_v38  ;;  %v1581_v28 = vmul.f32 1.442695, %v1458_v53 }
 0x455   : > { %v1583_v14 = vmul.f32 1.442695, %v1459_v55  ;;  %v1585_v23 = vmul.f32 1.442695, %v1460_v57  ;;  %3376 = vpow2.f32 %v1567_v3  ;;  %v2217_v5 = vrot.slane %v2201_v45, %v3985_v11  ;;  %v4823_v45 = vld [vmem:[#allocation37_spill] sm:$0xff] }
 0x456   : > { %v2231_v17 = vrot.slane %v2209_v35, %v3985_v11  ;;  %v1034_v18 = vadd.f32 %v1014_v33, %v978_v50  ;;  %3378 = vpow2.f32 %v1569_v42  ;;  %v1587_v19 = vmul.f32 1.442695, %v1461_v60  ;;  %v4831_v35 = vld [vmem:[#allocation13_spill] sm:$0xff] }
 0x457   : > { %v1589_v32 = vmul.f32 1.442695, %v1462_v22  ;;  %v2194_v26 = vcombine.high %v4263_v56, %v4263_v56  ;;  %3380 = vpow2.f32 %v1571_v27  ;;  %v2239_v13 = vcombine.high %v2217_v5, %v2217_v5  ;;  %v4824_v56 = vld [vmem:[#allocation38_spill] sm:$0xff] }
 0x458   : > { %v2241_v9 = vcombine.high %v2231_v17, %v2231_v17  ;;  %v2342_v21 = vrot.slane %v2217_v5, %v3746_v49  ;;  %3382 = vpow2.f32 %v1573_v29  ;;  %v2346_v31 = vrot.slane %v2231_v17, %v3746_v49 }
 0x459   : > { %v1092_v10 = vcombine.high %v1034_v18, %v1034_v18  ;;  %v1099_v20 = vrot.slane %v1034_v18, %v3985_v11  ;;  %3384 = vpow2.f32 %v1575_v44  ;;  %v2350_v30 = vrot.slane %v2239_v13, %v3746_v49 }
 0x45a   : > { %v2354_v50 = vrot.slane %v2241_v9, %v3746_v49  ;;  %v2451_v8 = vmul.f32 %v2342_v21, %v4823_v45  ;;  %3386 = vpow2.f32 %v1577_v15  ;;  %v2452_v43 = vmul.f32 %v2342_v21, %v4824_v56 }
 0x45b   : > { %v2453_v39 = vmul.f32 %v2346_v31, %v4825_v6  ;;  %v2454_v7 = vmul.f32 %v2346_v31, %v4826_v24  ;;  %3388 = vpow2.f32 %v1579_v16  ;;  %v2455_v1 = vmul.f32 %v2350_v30, %v4827_v61 }
 0x45c   : > { %v2456_v33 = vmul.f32 %v2350_v30, %v4828_v54  ;;  %v2457_v36 = vmul.f32 %v2354_v50, %v4829_v34  ;;  %2515 = vst.msk [vmem:[#allocation5 + $0x180] sm:$0xff] %vm774_vm2, %v2451_v8  ;;  %3390 = vpow2.f32 %v1581_v28  ;;  %v2458_v2 = vmul.f32 %v2354_v50, %v4830_v62  ;;  %2516 = vst.msk [vmem:[#allocation5 + $0x188] sm:$0xff] %vm774_vm2, %v2452_v43 }
 0x45d   : > { %2517 = vst.msk [vmem:[#allocation5 + $0x190] sm:$0xff] %vm774_vm2, %v2453_v39  ;;  %2518 = vst.msk [vmem:[#allocation5 + $0x198] sm:$0xff] %vm774_vm2, %v2454_v7  ;;  %v1106_v37 = vrot.slane %v1092_v10, %v3985_v11  ;;  %v1107_v40 = vcombine.high %v1099_v20, %v1099_v20  ;;  %3392 = vpow2.f32 %v1583_v14  ;;  %v1115_v41 = vrot.slane %v1099_v20, %v3985_v11 }
 0x45e   : > { %2519 = vst.msk [vmem:[#allocation5 + $0x1a0] sm:$0xff] %vm774_vm2, %v2455_v1  ;;  %2520 = vst.msk [vmem:[#allocation5 + $0x1a8] sm:$0xff] %vm774_vm2, %v2456_v33  ;;  %v3369_v46 = vpop.eup %3368  ;;  %3394 = vpow2.f32 %v1585_v23  ;;  %v4360_v58 = vrot.slane %v2194_v26, %v3985_v11  ;;  %v4369_v63 = vmul.f32 %v1034_v18, %v4831_v35  ;;  %v4835_v35 = vld [vmem:[#allocation50_spill] sm:$0xff] }
 0x45f   : > { %2521 = vst.msk [vmem:[#allocation5 + $0x1b0] sm:$0xff] %vm774_vm2, %v2457_v36  ;;  %2522 = vst.msk [vmem:[#allocation5 + $0x1b8] sm:$0xff] %vm774_vm2, %v2458_v2  ;;  %v1108_v47 = vcombine.high %v1106_v37, %v1106_v37  ;;  %v1122_v48 = vrot.slane %v1106_v37, %v3985_v11  ;;  %v1129_v51 = vrot.slane %v1107_v40, %v3985_v11  ;;  %v3371_v53 = vpop.eup %3370  ;;  %3396 = vpow2.f32 %v1587_v19 }
 0x460   : > { %1639 = vst.msk [vmem:[#allocation4 + $0x180] sm:$0xff] %vm774_vm2, %v3369_v46  ;;  %v1137_v55 = vcombine.high %v1115_v41, %v1115_v41  ;;  %v1274_v57 = vrot.slane %v1115_v41, %v3746_v49  ;;  %v3373_v59 = vpop.eup %3372  ;;  %3398 = vpow2.f32 %v1589_v32  ;;  %1640 = vst.msk [vmem:[#allocation4 + $0x188] sm:$0xff] %vm774_vm2, %v3371_v53  ;;  %v2224_v5 = vrot.slane %v4360_v58, %v3985_v11 }
 0x461   : > { %v1136_v60 = vrot.slane %v1108_v47, %v3985_v11  ;;  %v1138_v0 = vcombine.high %v1122_v48, %v1122_v48  ;;  %v1139_v4 = vcombine.high %v1129_v51, %v1129_v51  ;;  %v3375_v38 = vpop.eup %3374  ;;  %1641 = vst.msk [vmem:[#allocation4 + $0x190] sm:$0xff] %vm774_vm2, %v3373_v59  ;;  %v1278_v25 = vrot.slane %v1129_v51, %v3746_v49 }
 0x462   : > { %v1282_v22 = vrot.slane %v1137_v55, %v3746_v49  ;;  %v1290_v3 = vrot.slane %v1122_v48, %v3746_v49  ;;  %v3377_v42 = vpop.eup %3376  ;;  %1642 = vst.msk [vmem:[#allocation4 + $0x198] sm:$0xff] %vm774_vm2, %v3375_v38  ;;  %v1415_v28 = vmul.f32 %v1274_v57, %v4034_v12  ;;  %v1416_v14 = vmul.f32 %v1274_v57, %v4039_v52  ;;  %v4832_v57 = vld [vmem:[#allocation45_spill] sm:$0xff] }
 0x463   : > { %v1140_v27 = vcombine.high %v1136_v60, %v1136_v60  ;;  %v1286_v29 = vrot.slane %v1139_v4, %v3746_v49  ;;  %v1294_v44 = vrot.slane %v1136_v60, %v3746_v49  ;;  %v1298_v15 = vrot.slane %v1138_v0, %v3746_v49  ;;  %v3379_v16 = vpop.eup %3378  ;;  %1643 = vst.msk [vmem:[#allocation4 + $0x1a0] sm:$0xff] %vm774_vm2, %v3377_v42  ;;  %v4833_v0 = vld [vmem:[#allocation46_spill] sm:$0xff] }
 0x464   : > { %v1417_v23 = vmul.f32 %v1278_v25, %v4034_v12  ;;  %v3381_v17 = vpop.eup %3380  ;;  %1644 = vst.msk [vmem:[#allocation4 + $0x1a8] sm:$0xff] %vm774_vm2, %v3379_v16  ;;  %v1418_v19 = vmul.f32 %v1278_v25, %v4039_v52  ;;  %v1419_v32 = vmul.f32 %v1282_v22, %v4034_v12  ;;  %v1420_v26 = vmul.f32 %v1282_v22, %v4039_v52  ;;  %v4834_v22 = vld [vmem:[#allocation49_spill] sm:$0xff] }
 0x465   : > { %v1302_v18 = vrot.slane %v1140_v27, %v3746_v49  ;;  %v3383_v13 = vpop.eup %3382  ;;  %1645 = vst.msk [vmem:[#allocation4 + $0x1b0] sm:$0xff] %vm774_vm2, %v3381_v17  ;;  %v1421_v9 = vmul.f32 %v1286_v29, %v4034_v12  ;;  %v1422_v21 = vmul.f32 %v1286_v29, %v4039_v52  ;;  %v1423_v31 = vmul.f32 %v1290_v3, %v4034_v12 }
 0x466   : > { %v1424_v10 = vmul.f32 %v1290_v3, %v4039_v52  ;;  %v3385_v20 = vpop.eup %3384  ;;  %1646 = vst.msk [vmem:[#allocation4 + $0x1b8] sm:$0xff] %vm774_vm2, %v3383_v13  ;;  %v1425_v30 = vmul.f32 %v1294_v44, %v4034_v12  ;;  %v1426_v50 = vmul.f32 %v1294_v44, %v4039_v52  ;;  %v1427_v45 = vmul.f32 %v1298_v15, %v4034_v12  ;;  %v4837_v13 = vld [vmem:[#allocation48_spill] sm:$0xff] }
 0x467   : > { %v1428_v8 = vmul.f32 %v1298_v15, %v4039_v52  ;;  %v3387_v56 = vpop.eup %3386  ;;  %1647 = vst.msk [vmem:[#allocation4 + $0x1c0] sm:$0xff] %vm774_vm2, %v3385_v20  ;;  %v1429_v43 = vmul.f32 %v1302_v18, %v4034_v12  ;;  %v1495_v6 = vmul.f32 1.442695, %v1415_v28  ;;  %v1497_v39 = vmul.f32 1.442695, %v1416_v14  ;;  %v4839_v20 = vld [vmem:[#allocation56_spill] sm:$0xff] }
 0x468   : > { %v1499_v24 = vmul.f32 1.442695, %v1417_v23  ;;  %v3389_v7 = vpop.eup %3388  ;;  %1648 = vst.msk [vmem:[#allocation4 + $0x1c8] sm:$0xff] %vm774_vm2, %v3387_v56  ;;  %v1430_v61 = vmul.f32 %v1302_v18, %v4039_v52  ;;  %v1501_v1 = vmul.f32 1.442695, %v1418_v19  ;;  %v2240_v54 = vcombine.high %v2224_v5, %v2224_v5 }
 0x469   : > { %v2358_v33 = vrot.slane %v2224_v5, %v3746_v49  ;;  %v3391_v34 = vpop.eup %3390  ;;  %1649 = vst.msk [vmem:[#allocation4 + $0x1d0] sm:$0xff] %vm774_vm2, %v3389_v7  ;;  %3400 = vpow2.f32 %v1495_v6  ;;  %v1503_v36 = vmul.f32 1.442695, %v1419_v32  ;;  %v1505_v62 = vmul.f32 1.442695, %v1420_v26  ;;  %v4836_v32 = vld [vmem:[#allocation47_spill] sm:$0xff] }
 0x46a   : > { %v1507_v2 = vmul.f32 1.442695, %v1421_v9  ;;  %v3393_v12 = vpop.eup %3392  ;;  %1650 = vst.msk [vmem:[#allocation4 + $0x1d8] sm:$0xff] %vm774_vm2, %v3391_v34  ;;  %3402 = vpow2.f32 %v1497_v39  ;;  %v1509_v37 = vmul.f32 1.442695, %v1422_v21  ;;  %v2366_v55 = vrot.slane %v2240_v54, %v3746_v49  ;;  %v4838_v21 = vld [vmem:[#allocation54_spill] sm:$0xff] }
 0x46b   : > { %v1511_v40 = vmul.f32 1.442695, %v1423_v31  ;;  %v1513_v41 = vmul.f32 1.442695, %v1424_v10  ;;  %v3395_v46 = vpop.eup %3394  ;;  %1651 = vst.msk [vmem:[#allocation4 + $0x1e0] sm:$0xff] %vm774_vm2, %v3393_v12  ;;  %3404 = vpow2.f32 %v1499_v24  ;;  %v2459_v59 = vmul.f32 %v2358_v33, %v4832_v57  ;;  %v4842_v39 = vld [vmem:[#allocation55_spill] sm:$0xff] }
 0x46c   : > { %v1515_v52 = vmul.f32 1.442695, %v1425_v30  ;;  %v1517_v47 = vmul.f32 1.442695, %v1426_v50  ;;  %v1519_v48 = vmul.f32 1.442695, %v1427_v45  ;;  %v3397_v51 = vpop.eup %3396  ;;  %3406 = vpow2.f32 %v1501_v1 }
 0x46d   : > { %1652 = vst.msk [vmem:[#allocation4 + $0x1e8] sm:$0xff] %vm774_vm2, %v3395_v46  ;;  %v1521_v53 = vmul.f32 1.442695, %v1428_v8  ;;  %v3399_v60 = vpop.eup %3398  ;;  %1653 = vst.msk [vmem:[#allocation4 + $0x1f0] sm:$0xff] %vm774_vm2, %v3397_v51  ;;  %3408 = vpow2.f32 %v1503_v36  ;;  %v2460_v4 = vmul.f32 %v2358_v33, %v4833_v0  ;;  %v2210_v38 = vcombine.high %v4360_v58, %v4360_v58  ;;  %v4840_v50 = vld [vmem:[#allocation51_spill] sm:$0xff]  ;;  %v4841_v8 = vld [vmem:[#allocation53_spill] sm:$0xff] }
 0x46e   : > { %v2103_v25 = vrot.slane %v4369_v63, %v3985_v11  ;;  %1654 = vst.msk [vmem:[#allocation4 + $0x1f8] sm:$0xff] %vm774_vm2, %v3399_v60  ;;  %3410 = vpow2.f32 %v1505_v62  ;;  %v2463_v3 = vmul.f32 %v2366_v55, %v4834_v22  ;;  %v2464_v42 = vmul.f32 %v2366_v55, %v4835_v35  ;;  %2523 = vst.msk [vmem:[#allocation5 + $0x1c0] sm:$0xff] %vm774_vm2, %v2459_v59  ;;  %v4843_v7 = vld [vmem:[#allocation58_spill] sm:$0xff]  ;;  %v4844_v33 = vld [vmem:[#allocation57_spill] sm:$0xff] }
 0x46f   : > { %v2096_v27 = vcombine.high %v4369_v63, %v4369_v63  ;;  %3412 = vpow2.f32 %v1507_v2  ;;  %2524 = vst.msk [vmem:[#allocation5 + $0x1c8] sm:$0xff] %vm774_vm2, %v2460_v4  ;;  %v2238_v58 = vrot.slane %v2210_v38, %v3985_v11  ;;  %v1523_v15 = vmul.f32 1.442695, %v1429_v43  ;;  %v4845_v36 = vld [vmem:[#allocation60_spill] sm:$0xff]  ;;  %v4848_v55 = vld [vmem:[#allocation59_spill] sm:$0xff]  ;;  %v4849_v59 = vld [vmem:[#allocation62_spill] sm:$0xff] }
 0x470   : > { %v2119_v29 = vrot.slane %v2103_v25, %v3985_v11  ;;  %v2111_v44 = vcombine.high %v2103_v25, %v2103_v25  ;;  %3414 = vpow2.f32 %v1509_v37  ;;  %v1525_v16 = vmul.f32 1.442695, %v1430_v61  ;;  %2527 = vst.msk [vmem:[#allocation5 + $0x1e0] sm:$0xff] %vm774_vm2, %v2463_v3  ;;  %2528 = vst.msk [vmem:[#allocation5 + $0x1e8] sm:$0xff] %vm774_vm2, %v2464_v42  ;;  %v4850_v3 = vld [vmem:[#allocation65_spill] sm:$0xff] }
 0x471   : > { %v2110_v28 = vrot.slane %v2096_v27, %v3985_v11  ;;  %3416 = vpow2.f32 %v1511_v40  ;;  %v2242_v14 = vcombine.high %v2238_v58, %v2238_v58  ;;  %v2362_v63 = vrot.slane %v2238_v58, %v3746_v49  ;;  %v4851_v42 = vld [vmem:[#allocation69_spill] sm:$0xff] }
 0x472   : > { %v2278_v23 = vrot.slane %v2119_v29, %v3746_v49  ;;  %3418 = vpow2.f32 %v1513_v41  ;;  %v2133_v5 = vrot.slane %v2111_v44, %v3985_v11  ;;  %v2141_v17 = vcombine.high %v2119_v29, %v2119_v29  ;;  %v4852_v44 = vld [vmem:[#allocation63_spill] sm:$0xff] }
 0x473   : > { %v2126_v18 = vrot.slane %v2110_v28, %v3985_v11  ;;  %3420 = vpow2.f32 %v1515_v52  ;;  %v2370_v19 = vrot.slane %v2242_v14, %v3746_v49  ;;  %v2461_v26 = vmul.f32 %v2362_v63, %v4836_v32  ;;  %v4846_v52 = vld [vmem:[#allocation61_spill] sm:$0xff] }
 0x474   : > { %v2462_v9 = vmul.f32 %v2362_v63, %v4837_v13  ;;  %3422 = vpow2.f32 %v1517_v47  ;;  %v2419_v31 = vmul.f32 %v2278_v23, %v4838_v21  ;;  %v2282_v10 = vrot.slane %v2133_v5, %v3746_v49 }
 0x475   : > { %v2420_v30 = vmul.f32 %v2278_v23, %v4839_v20  ;;  %3424 = vpow2.f32 %v1519_v48  ;;  %v2465_v45 = vmul.f32 %v2370_v19, %v4840_v50  ;;  %2525 = vst.msk [vmem:[#allocation5 + $0x1d0] sm:$0xff] %vm774_vm2, %v2461_v26  ;;  %v2466_v56 = vmul.f32 %v2370_v19, %v4841_v8  ;;  %v4847_v48 = vld [vmem:[#allocation64_spill] sm:$0xff] }
 0x476   : > { %2526 = vst.msk [vmem:[#allocation5 + $0x1d8] sm:$0xff] %vm774_vm2, %v2462_v9  ;;  %v2286_v43 = vrot.slane %v2141_v17, %v3746_v49  ;;  %v3401_v6 = vpop.eup %3400  ;;  %3426 = vpow2.f32 %v1521_v53  ;;  %2483 = vst.msk [vmem:[#allocation5 + $0x80] sm:$0xff] %vm774_vm2, %v2419_v31  ;;  %v2421_v24 = vmul.f32 %v2282_v10, %v4842_v39  ;;  %v2422_v61 = vmul.f32 %v2282_v10, %v4843_v7 }
 0x477   : > { %2484 = vst.msk [vmem:[#allocation5 + $0x88] sm:$0xff] %vm774_vm2, %v2420_v30  ;;  %v2143_v1 = vcombine.high %v2133_v5, %v2133_v5  ;;  %v3403_v54 = vpop.eup %3402  ;;  %3428 = vpow2.f32 %v1523_v15  ;;  %1607 = vst.msk [vmem:[#allocation4 + $0x80] sm:$0xff] %vm774_vm2, %v3401_v6  ;;  %v2294_v2 = vrot.slane %v2126_v18, %v3746_v49  ;;  %v2112_v40 = vcombine.high %v2110_v28, %v2110_v28  ;;  %v4854_v5 = vld [vmem:[#allocation68_spill] sm:$0xff] }
 0x478   : > { %2529 = vst.msk [vmem:[#allocation5 + $0x1f0] sm:$0xff] %vm774_vm2, %v2465_v45  ;;  %2530 = vst.msk [vmem:[#allocation5 + $0x1f8] sm:$0xff] %vm774_vm2, %v2466_v56  ;;  %v2423_v34 = vmul.f32 %v2286_v43, %v4844_v33  ;;  %v2424_v62 = vmul.f32 %v2286_v43, %v4845_v36  ;;  %v3405_v12 = vpop.eup %3404  ;;  %3430 = vpow2.f32 %v1525_v16  ;;  %v2142_v41 = vcombine.high %v2126_v18, %v2126_v18  ;;  %v4853_v16 = vld [vmem:[#allocation67_spill] sm:$0xff] }
 0x479   : > { %1608 = vst.msk [vmem:[#allocation4 + $0x88] sm:$0xff] %vm774_vm2, %v3403_v54  ;;  %2485 = vst.msk [vmem:[#allocation5 + $0x90] sm:$0xff] %vm774_vm2, %v2421_v24  ;;  %v2290_v37 = vrot.slane %v2143_v1, %v3746_v49  ;;  %v3407_v46 = vpop.eup %3406  ;;  %v2427_v47 = vmul.f32 %v2294_v2, %v4846_v52  ;;  %v2428_v51 = vmul.f32 %v2294_v2, %v4847_v48  ;;  %v4855_v18 = vld [vmem:[#allocation71_spill] sm:$0xff] }
 0x47a   : > { %2486 = vst.msk [vmem:[#allocation5 + $0x98] sm:$0xff] %vm774_vm2, %v2422_v61  ;;  %1609 = vst.msk [vmem:[#allocation4 + $0x90] sm:$0xff] %vm774_vm2, %v3405_v12  ;;  %v3409_v53 = vpop.eup %3408  ;;  %v2140_v0 = vrot.slane %v2112_v40, %v3985_v11  ;;  %v2302_v4 = vrot.slane %v2142_v41, %v3746_v49 }
 0x47b   : > { %2487 = vst.msk [vmem:[#allocation5 + $0xa0] sm:$0xff] %vm774_vm2, %v2423_v34  ;;  %2488 = vst.msk [vmem:[#allocation5 + $0xa8] sm:$0xff] %vm774_vm2, %v2424_v62  ;;  %v2425_v57 = vmul.f32 %v2290_v37, %v4848_v55  ;;  %v2426_v60 = vmul.f32 %v2290_v37, %v4849_v59  ;;  %v3411_v38 = vpop.eup %3410 }
 0x47c   : > { %1610 = vst.msk [vmem:[#allocation4 + $0x98] sm:$0xff] %vm774_vm2, %v3407_v46  ;;  %1611 = vst.msk [vmem:[#allocation4 + $0xa0] sm:$0xff] %vm774_vm2, %v3409_v53  ;;  %v3413_v25 = vpop.eup %3412  ;;  %v2298_v22 = vrot.slane %v2140_v0, %v3746_v49  ;;  %v2431_v11 = vmul.f32 %v2302_v4, %v4850_v3  ;;  %v2144_v35 = vcombine.high %v2140_v0, %v2140_v0 }
 0x47d   : > { %2491 = vst.msk [vmem:[#allocation5 + $0xc0] sm:$0xff] %vm774_vm2, %v2427_v47  ;;  %2492 = vst.msk [vmem:[#allocation5 + $0xc8] sm:$0xff] %vm774_vm2, %v2428_v51  ;;  %v2432_v27 = vmul.f32 %v2302_v4, %v4851_v42  ;;  %v3415_v58 = vpop.eup %3414 }
 0x47e   : > { %1612 = vst.msk [vmem:[#allocation4 + $0xa8] sm:$0xff] %vm774_vm2, %v3411_v38  ;;  %2489 = vst.msk [vmem:[#allocation5 + $0xb0] sm:$0xff] %vm774_vm2, %v2425_v57  ;;  %v3417_v29 = vpop.eup %3416  ;;  %v2429_v15 = vmul.f32 %v2298_v22, %v4852_v44  ;;  %v2430_v28 = vmul.f32 %v2298_v22, %v4853_v16  ;;  %v2306_v14 = vrot.slane %v2144_v35, %v3746_v49 }
 0x47f   : > { %2490 = vst.msk [vmem:[#allocation5 + $0xb8] sm:$0xff] %vm774_vm2, %v2426_v60  ;;  %1613 = vst.msk [vmem:[#allocation4 + $0xb0] sm:$0xff] %vm774_vm2, %v3413_v25  ;;  %v3419_v63 = vpop.eup %3418 }
 0x480   : > { %1614 = vst.msk [vmem:[#allocation4 + $0xb8] sm:$0xff] %vm774_vm2, %v3415_v58  ;;  %2495 = vst.msk [vmem:[#allocation5 + $0xe0] sm:$0xff] %vm774_vm2, %v2431_v11  ;;  %v3421_v23 = vpop.eup %3420  ;;  %v2433_v17 = vmul.f32 %v2306_v14, %v4854_v5  ;;  %v2434_v19 = vmul.f32 %v2306_v14, %v4855_v18 }
 0x481   : > { %2496 = vst.msk [vmem:[#allocation5 + $0xe8] sm:$0xff] %vm774_vm2, %v2432_v27  ;;  %1615 = vst.msk [vmem:[#allocation4 + $0xc0] sm:$0xff] %vm774_vm2, %v3417_v29  ;;  %v3423_v32 = vpop.eup %3422 }
 0x482   : > { %1616 = vst.msk [vmem:[#allocation4 + $0xc8] sm:$0xff] %vm774_vm2, %v3419_v63  ;;  %2493 = vst.msk [vmem:[#allocation5 + $0xd0] sm:$0xff] %vm774_vm2, %v2429_v15  ;;  %v3425_v26 = vpop.eup %3424 }
 0x483   : > { %2494 = vst.msk [vmem:[#allocation5 + $0xd8] sm:$0xff] %vm774_vm2, %v2430_v28  ;;  %1617 = vst.msk [vmem:[#allocation4 + $0xd0] sm:$0xff] %vm774_vm2, %v3421_v23  ;;  %v3427_v13 = vpop.eup %3426 }
 0x484   : > { %1618 = vst.msk [vmem:[#allocation4 + $0xd8] sm:$0xff] %vm774_vm2, %v3423_v32  ;;  %2497 = vst.msk [vmem:[#allocation5 + $0xf0] sm:$0xff] %vm774_vm2, %v2433_v17  ;;  %v3429_v9 = vpop.eup %3428 }
 0x485   : > { %2498 = vst.msk [vmem:[#allocation5 + $0xf8] sm:$0xff] %vm774_vm2, %v2434_v19  ;;  %1619 = vst.msk [vmem:[#allocation4 + $0xe0] sm:$0xff] %vm774_vm2, %v3425_v26  ;;  %v3431_v21 = vpop.eup %3430 }
 0x486   : > { %1620 = vst.msk [vmem:[#allocation4 + $0xe8] sm:$0xff] %vm774_vm2, %v3427_v13  ;;  %1621 = vst.msk [vmem:[#allocation4 + $0xf0] sm:$0xff] %vm774_vm2, %v3429_v9 }
 0x487   : > { %1622 = vst.msk [vmem:[#allocation4 + $0xf8] sm:$0xff] %vm774_vm2, %v3431_v21 }
 0x488 LB: >> { %s3132_s20 = sshll.u32 %s3498_s18, 3  ;;  %s3147_s21 = sshll.u32 %s3498_s18, 7  ;;  %v2596_v31 = vld [vmem:[#allocation2] sm:$0xff]  ;;  %v2597_v20 = vld [vmem:[#allocation2 + $0x8] sm:$0xff]  ;;  %v4856_v56 = vld [vmem:[#allocation16_spill] sm:$0xff]  ;;  %vm2816_vm0 = vcmask 1041409   ;;  %s3498_s18 = sphi %s4494_s18, %s2557_s18  }
 0x489   : >> { %s4501_s22 = scalar_lea.vmem [#allocation4], %s3147_s21  ;;  %s2594_s28 = scalar_lea.vmem [#allocation6], %s3132_s20  ;;  %v4857_v2 = vld [vmem:[#allocation17_spill] sm:$0xff]  ;;  %v4858_v53 = vld [vmem:[#allocation18_spill] sm:$0xff]  ;;  %v4859_v3 = vld [vmem:[#allocation19_spill] sm:$0xff]  ;;  %vm2818_vm3 = vcmask 1042434  }
 0x48a   : >> { %v4506_v30 = vld [vmem:[%s2594_s28] sm:$0xff]  ;;  %s4508_s29 = scalar_lea.vmem [#allocation5], %s3147_s21  ;;  %v4860_v28 = vld [vmem:[#allocation20_spill] sm:$0xff]  ;;  %v4861_v13 = vld [vmem:[#allocation21_spill] sm:$0xff]  ;;  %vm2820_vm4 = vcmask 1043459   ;;  %vm2822_vm5 = vcmask 1044484  }
 0x48b   : >> { %v2646_v43 = vrot.slane %v4506_v30, %v4856_v56  ;;  %v2635_v6 = vrot.slane %v4506_v30, %v3746_v49  ;;  %v2657_v12 = vrot.slane %v4506_v30, %v4857_v2  ;;  %v2668_v55 = vrot.slane %v4506_v30, %v4858_v53  ;;  %s2831_s30 = scalar_lea.vmem [#allocation7], %s3132_s20  ;;  %s2557_s18 = sadd.s32 1, %s3498_s18  }
 0x48c   : >> { %v2578_v50 = vld [vmem:[%s4508_s29] sm:$0xff]  ;;  %v2579_v24 = vld [vmem:[%s4508_s29 + $0x8] sm:$0xff]  ;;  %v2580_v1 = vld [vmem:[%s4508_s29 + $0x10] sm:$0xff]  ;;  %v2679_v11 = vrot.slane %v4506_v30, %v4859_v3  ;;  %v2690_v14 = vrot.slane %v4506_v30, %v4860_v28  ;;  %v2701_v9 = vrot.slane %v4506_v30, %v4861_v13  ;;  %vm2824_vm6 = vcmask 1045509   ;;  %p2554_p8 = scmp.ge.s32.totalorder %s2557_s18, 4  }
 0x48d   : >> { %2648 = vbcast.lane.b32.xlu1 %v2646_v43, 256  ;;  %2637 = vbcast.lane.b32.xlu0 %v2635_v6, 256  ;;  %v2581_v36 = vld [vmem:[%s4508_s29 + $0x18] sm:$0xff]  ;;  %v2582_v46 = vld [vmem:[%s4508_s29 + $0x20] sm:$0xff]  ;;  %v2583_v48 = vld [vmem:[%s4508_s29 + $0x28] sm:$0xff]  ;;  %vm2826_vm7 = vcmask 1046534  }
 0x48e   : >> { %v2561_v10 = vld [vmem:[%s4501_s22] sm:$0xff]  ;;  %v2562_v8 = vld [vmem:[%s4501_s22 + $0x8] sm:$0xff]  ;;  %v2563_v39 = vld [vmem:[%s4501_s22 + $0x10] sm:$0xff]  ;;  %vm2828_vm8 = vcmask 1047559  }
 0x48f   : >> { %v2598_v45 = vmul.f32 %v2596_v31, %v2561_v10  ;;  %v2599_v61 = vmul.f32 %v2597_v20, %v2562_v8  ;;  %v2564_v54 = vld [vmem:[%s4501_s22 + $0x18] sm:$0xff]  ;;  %v2565_v62 = vld [vmem:[%s4501_s22 + $0x20] sm:$0xff]  ;;  %v2566_v41 = vld [vmem:[%s4501_s22 + $0x28] sm:$0xff] }
 0x490   : >> { %v2567_v51 = vld [vmem:[%s4501_s22 + $0x30] sm:$0xff]  ;;  %v2568_v60 = vld [vmem:[%s4501_s22 + $0x38] sm:$0xff]  ;;  %v2569_v22 = vld [vmem:[%s4501_s22 + $0x40] sm:$0xff] }
 0x491   : >> { %v4518_v7 = vadd.f32 %v2598_v45, %v2578_v50  ;;  %v4523_v34 = vadd.f32 %v2599_v61, %v2579_v24  ;;  %2652 = vbcast.lane.b32.xlu1 %v2646_v43, 264  ;;  %2641 = vbcast.lane.b32.xlu0 %v2635_v6, 264  ;;  %v2584_v0 = vld [vmem:[%s4508_s29 + $0x30] sm:$0xff]  ;;  %v2585_v25 = vld [vmem:[%s4508_s29 + $0x38] sm:$0xff]  ;;  %v2570_v27 = vld [vmem:[%s4501_s22 + $0x48] sm:$0xff] }
 0x492   : >> { %v2586_v58 = vld [vmem:[%s4508_s29 + $0x40] sm:$0xff]  ;;  %v2587_v15 = vld [vmem:[%s4508_s29 + $0x48] sm:$0xff]  ;;  %v2571_v16 = vld [vmem:[%s4501_s22 + $0x50] sm:$0xff] }
 0x493   : >> { %v2602_v33 = vmul.f32 %v4518_v7, %v2563_v39  ;;  %v2603_v40 = vmul.f32 %v4523_v34, %v2564_v54  ;;  %v2572_v5 = vld [vmem:[%s4501_s22 + $0x58] sm:$0xff]  ;;  %v2588_v17 = vld [vmem:[%s4508_s29 + $0x50] sm:$0xff]  ;;  %v2573_v26 = vld [vmem:[%s4501_s22 + $0x60] sm:$0xff] }
 0x494   : >> { %v2589_v32 = vld [vmem:[%s4508_s29 + $0x58] sm:$0xff]  ;;  %v2574_v10 = vld [vmem:[%s4501_s22 + $0x68] sm:$0xff]  ;;  %v2590_v20 = vld [vmem:[%s4508_s29 + $0x60] sm:$0xff] }
 0x495   : >> { %v4529_v37 = vadd.f32 %v2602_v33, %v2580_v1  ;;  %v4534_v52 = vadd.f32 %v2603_v40, %v2581_v36  ;;  %2663 = vbcast.lane.b32.xlu1 %v2657_v12, 264  ;;  %2659 = vbcast.lane.b32.xlu0 %v2657_v12, 256  ;;  %v2591_v8 = vld [vmem:[%s4508_s29 + $0x68] sm:$0xff]  ;;  %v2575_v56 = vld [vmem:[%s4501_s22 + $0x70] sm:$0xff]  ;;  %v4862_v43 = vld [vmem:[#allocation22_spill] sm:$0xff] }
 0x496   : >> { %v2712_v6 = vrot.slane %v4506_v30, %v4862_v43  ;;  %v2576_v61 = vld [vmem:[%s4501_s22 + $0x78] sm:$0xff]  ;;  %v2592_v1 = vld [vmem:[%s4508_s29 + $0x70] sm:$0xff]  ;;  %s3503_s22 = smov (%p2554_p8), 64  }
 0x497   : >> { %v2606_v47 = vmul.f32 %v4529_v37, %v2565_v62  ;;  %v2607_v57 = vmul.f32 %v4534_v52, %v2566_v41  ;;  %v2593_v36 = vld [vmem:[%s4508_s29 + $0x78] sm:$0xff] }
 0x499   : >> { %v4542_v59 = vadd.f32 %v2606_v47, %v2582_v46  ;;  %v4546_v4 = vadd.f32 %v2607_v57, %v2583_v48  ;;  %2674 = vbcast.lane.b32.xlu1 %v2668_v55, 264  ;;  %2670 = vbcast.lane.b32.xlu0 %v2668_v55, 256 }
 0x49b   : >> { %v2610_v38 = vmul.f32 %v4542_v59, %v2567_v51  ;;  %v2611_v35 = vmul.f32 %v4546_v4, %v2568_v60 }
 0x49d   : >> { %v4554_v42 = vadd.f32 %v2610_v38, %v2584_v0  ;;  %v4558_v29 = vadd.f32 %v2611_v35, %v2585_v25  ;;  %2685 = vbcast.lane.b32.xlu1 %v2679_v11, 264  ;;  %2681 = vbcast.lane.b32.xlu0 %v2679_v11, 256 }
 0x49f   : >> { %v2614_v44 = vmul.f32 %v4554_v42, %v2569_v22  ;;  %v2615_v63 = vmul.f32 %v4558_v29, %v2570_v27 }
 0x4a1   : >> { %v4566_v23 = vadd.f32 %v2614_v44, %v2586_v58  ;;  %v4570_v18 = vadd.f32 %v2615_v63, %v2587_v15  ;;  %2696 = vbcast.lane.b32.xlu1 %v2690_v14, 264  ;;  %2692 = vbcast.lane.b32.xlu0 %v2690_v14, 256 }
 0x4a3   : >> { %v2618_v19 = vmul.f32 %v4566_v23, %v2571_v16  ;;  %v2619_v21 = vmul.f32 %v4570_v18, %v2572_v5 }
 0x4a5   : >> { %v4578_v31 = vadd.f32 %v2618_v19, %v2588_v17  ;;  %v4582_v50 = vadd.f32 %v2619_v21, %v2589_v32  ;;  %2707 = vbcast.lane.b32.xlu1 %v2701_v9, 264  ;;  %2703 = vbcast.lane.b32.xlu0 %v2701_v9, 256 }
 0x4a7   : >> { %v2622_v45 = vmul.f32 %v4578_v31, %v2573_v26  ;;  %v2623_v39 = vmul.f32 %v4582_v50, %v2574_v10 }
 0x4a9   : >> { %v4590_v24 = vadd.f32 %v2622_v45, %v2590_v20  ;;  %v4594_v54 = vadd.f32 %v2623_v39, %v2591_v8  ;;  %2718 = vbcast.lane.b32.xlu1 %v2712_v6, 264  ;;  %2714 = vbcast.lane.b32.xlu0 %v2712_v6, 256 }
 0x4ab   : >> { %v2626_v33 = vmul.f32 %v4590_v24, %v2575_v56  ;;  %v2627_v62 = vmul.f32 %v4594_v54, %v2576_v61 }
 0x4ad   : >> { %v4599_v2 = vadd.f32 %v2626_v33, %v2592_v1  ;;  %v4601_v12 = vadd.f32 %v2627_v62, %v2593_v36 }
 0x4af   : >> { %2630 = vst.msk [vmem:[#allocation2] sm:$0xff] %vm774_vm2, %v4599_v2  ;;  %2631 = vst.msk [vmem:[#allocation2 + $0x8] sm:$0xff] %vm774_vm2, %v4601_v12 }
 0x4ff   : >> { %v2649_v30 = vpop.permute.xlu1 %2648  ;;  %v2638_v40 = vpop.permute.xlu0 %2637 }
 0x500   : >> { %v2722_v51 = vmul.f32 %v2649_v30, %v4529_v37  ;;  %v2720_v53 = vmul.f32 %v2638_v40, %v4518_v7 }
 0x502   : >> { %v2745_v22 = vsel %vm774_vm2, %v2722_v51, 0.0 }
 0x503   : >> { %v2653_v41 = vpop.permute.xlu1 %2652  ;;  %v2642_v46 = vpop.permute.xlu0 %2641 }
 0x504   : >> { %v2723_v47 = vmul.f32 %v2653_v41, %v4534_v52  ;;  %v2721_v48 = vmul.f32 %v2642_v46, %v4523_v34  ;;  %v2736_v52 = vsel %vm774_vm2, %v2720_v53, 0.0 }
 0x506   : >> { %v2746_v55 = vsel %vm774_vm2, %v2723_v47, 0.0  ;;  %v2737_v0 = vsel %vm774_vm2, %v2721_v48, 0.0 }
 0x507   : >> { %v2664_v57 = vpop.permute.xlu1 %2663  ;;  %v2660_v60 = vpop.permute.xlu0 %2659  ;;  %v2747_v3 = vadd.f32 %v2746_v55, %v2745_v22  ;;  %v2738_v7 = vadd.f32 %v2737_v0, %v2736_v52 }
 0x508   : >> { %v2725_v38 = vmul.f32 %v2664_v57, %v4546_v4  ;;  %v2724_v25 = vmul.f32 %v2660_v60, %v4542_v59 }
 0x509   : >> { %v2748_v4 = vrot.slane %v2747_v3, 4  ;;  %v2739_v16 = vrot.slane %v2738_v7, 4 }
 0x50a   : >> { %v2755_v34 = vsel %vm774_vm2, %v2725_v38, 0.0  ;;  %v2754_v37 = vsel %vm774_vm2, %v2724_v25, 0.0 }
 0x50b   : >> { %v2675_v11 = vpop.permute.xlu1 %2674  ;;  %v2671_v35 = vpop.permute.xlu0 %2670  ;;  %v2756_v27 = vadd.f32 %v2755_v34, %v2754_v37  ;;  %v2749_v26 = vadd.f32 %v2748_v4, %v2747_v3  ;;  %v2740_v13 = vadd.f32 %v2739_v16, %v2738_v7 }
 0x50c   : >> { %v2727_v58 = vmul.f32 %v2675_v11, %v4558_v29  ;;  %v2726_v44 = vmul.f32 %v2671_v35, %v4554_v42 }
 0x50d   : >> { %v2757_v5 = vrot.slane %v2756_v27, 4  ;;  %v2750_v43 = vrot.slane %v2749_v26, 2  ;;  %v2741_v39 = vrot.slane %v2740_v13, 2 }
 0x50e   : >> { %v2764_v59 = vsel %vm774_vm2, %v2727_v58, 0.0  ;;  %v2763_v15 = vsel %vm774_vm2, %v2726_v44, 0.0 }
 0x50f   : >> { %v2765_v28 = vadd.f32 %v2764_v59, %v2763_v15  ;;  %v2686_v14 = vpop.permute.xlu1 %2685  ;;  %v2682_v63 = vpop.permute.xlu0 %2681  ;;  %v2758_v10 = vadd.f32 %v2757_v5, %v2756_v27  ;;  %v2742_v51 = vadd.f32 %v2741_v39, %v2740_v13 }
 0x510   : >> { %v2729_v17 = vmul.f32 %v2686_v14, %v4570_v18  ;;  %v2728_v19 = vmul.f32 %v2682_v63, %v4566_v23 }
 0x511   : >> { %v2766_v32 = vrot.slane %v2765_v28, 4  ;;  %v2759_v36 = vrot.slane %v2758_v10, 2  ;;  %v2743_v7 = vrot.slane %v2742_v51, 1 }
 0x512   : >> { %v2773_v29 = vsel %vm774_vm2, %v2729_v17, 0.0  ;;  %v2772_v42 = vsel %vm774_vm2, %v2728_v19, 0.0 }
 0x513   : >> { %v2697_v9 = vpop.permute.xlu1 %2696  ;;  %v2693_v21 = vpop.permute.xlu0 %2692  ;;  %v2774_v20 = vadd.f32 %v2773_v29, %v2772_v42  ;;  %v2767_v56 = vadd.f32 %v2766_v32, %v2765_v28  ;;  %v2760_v0 = vadd.f32 %v2759_v36, %v2758_v10  ;;  %v4866_v36 = vld [vmem:[#allocation11_spill] sm:$0xff] (%p2554_p8) }
 0x514   : >> { %v2731_v45 = vmul.f32 %v2697_v9, %v4582_v50  ;;  %v2730_v8 = vmul.f32 %v2693_v21, %v4578_v31  ;;  %v2751_v31 = vadd.f32 %v2750_v43, %v2749_v26 }
 0x515   : >> { %v2775_v18 = vrot.slane %v2774_v20, 4  ;;  %v2768_v50 = vrot.slane %v2767_v56, 2  ;;  %v2761_v58 = vrot.slane %v2760_v0, 1 }
 0x516   : >> { %v2782_v23 = vsel %vm774_vm2, %v2731_v45, 0.0  ;;  %v2781_v6 = vsel %vm774_vm2, %v2730_v8, 0.0  ;;  %v2752_v52 = vrot.slane %v2751_v31, 1 }
 0x517   : >> { %v2783_v61 = vadd.f32 %v2782_v23, %v2781_v6  ;;  %v2708_v1 = vpop.permute.xlu1 %2707  ;;  %v2704_v33 = vpop.permute.xlu0 %2703  ;;  %v2776_v62 = vadd.f32 %v2775_v18, %v2774_v20  ;;  %v2769_v25 = vadd.f32 %v2768_v50, %v2767_v56  ;;  %v2762_v63 = vadd.f32 %v2761_v58, %v2760_v0  ;;  %v4863_v18 = vld [vmem:[#allocation8_spill] sm:$0xff] (%p2554_p8)  ;;  %v4864_v6 = vld [vmem:[#allocation9_spill] sm:$0xff] (%p2554_p8) }
 0x518   : >> { %v2733_v30 = vmul.f32 %v2708_v1, %v4594_v54  ;;  %v2732_v40 = vmul.f32 %v2704_v33, %v4590_v24  ;;  %v3137_v23 = vmul.f32 (%p2554_p8), -1.442695, %v4863_v18  ;;  %v3135_v39 = vmul.f32 (%p2554_p8), -1.442695, %v4864_v6  ;;  %v4865_v1 = vld [vmem:[#allocation10_spill] sm:$0xff] (%p2554_p8)  ;;  %v4870_v58 = vld [vmem:[#allocation13_spill] sm:$0xff] (%p2554_p8) }
 0x519   : >> { %v2784_v41 = vrot.slane %v2783_v61, 4  ;;  %v2777_v46 = vrot.slane %v2776_v62, 2  ;;  %v2770_v44 = vrot.slane %v2769_v25, 1  ;;  %v3138_v33 = vmul.f32 (%p2554_p8), -1.442695, %v4865_v1 }
 0x51a   : >> { %v2791_v47 = vsel %vm774_vm2, %v2733_v30, 0.0  ;;  %v2790_v48 = vsel %vm774_vm2, %v2732_v40, 0.0  ;;  %3436 = vpow2.f32 (%p2554_p8), %v3137_v23  ;;  %v3433_v30 = vld [vmem:[%s4708_s11 + $0x10] sm:$0xff] (%p2554_p8)  }
 0x51b   : >> { %v2785_v53 = vadd.f32 %v2784_v41, %v2783_v61  ;;  %v2792_v55 = vadd.f32 %v2791_v47, %v2790_v48  ;;  %v2719_v57 = vpop.permute.xlu1 %2718  ;;  %v2715_v60 = vpop.permute.xlu0 %2714  ;;  %v2778_v3 = vadd.f32 %v2777_v46, %v2776_v62  ;;  %v2771_v5 = vadd.f32 %v2770_v44, %v2769_v25  ;;  %v3432_v61 = vld [vmem:[%s4708_s11 + $0x18] sm:$0xff] (%p2554_p8)  }
 0x51c   : >> { %v2735_v38 = vmul.f32 %v2719_v57, %v4601_v12  ;;  %v2734_v54 = vmul.f32 %v2715_v60, %v4599_v2  ;;  %v2753_v12 = vadd.f32 %v2752_v52, %v2751_v31  ;;  %v2744_v2 = vadd.f32 %v2743_v7, %v2742_v51  ;;  %3193 = vmatprep.subr.bf16.mxu0 (%p2554_p8), %v3432_v61  ;;  %v3434_v51 = vld [vmem:[%s4708_s11 + $0x8] sm:$0xff] (%p2554_p8)   ;;  %v4867_v52 = vld [vmem:[#allocation14_spill] sm:$0xff] (%p2554_p8) }
 0x51d   : >> { %v2786_v24 = vrot.slane %v2785_v53, 2  ;;  %v2793_v22 = vrot.slane %v2792_v55, 4  ;;  %v2779_v15 = vrot.slane %v2778_v3, 1  ;;  %v3136_v62 = vmul.f32 (%p2554_p8), -1.442695, %v4866_v36  ;;  %3194 = vmatpush3.bf16.msra.mxu0 (%p2554_p8), %v3432_v61 }
 0x51e   : >> { %v2800_v34 = vsel %vm774_vm2, %v2735_v38, 0.0  ;;  %v2799_v37 = vsel %vm774_vm2, %v2734_v54, 0.0  ;;  %v2817_v26 = vsel %vm2816_vm0, %v2753_v12, %v2744_v2  ;;  %3438 = vpow2.f32 (%p2554_p8), %v3135_v39  ;;  %3195 = vmatprep.subr.bf16.mxu0 (%p2554_p8), %v3433_v30 }
 0x51f   : >> { %v2787_v11 = vadd.f32 %v2786_v24, %v2785_v53  ;;  %v2794_v35 = vadd.f32 %v2793_v22, %v2792_v55  ;;  %v2801_v27 = vadd.f32 %v2800_v34, %v2799_v37  ;;  %v2780_v32 = vadd.f32 %v2779_v15, %v2778_v3  ;;  %v3435_v53 = vld [vmem:[%s4708_s11] sm:$0xff] (%p2554_p8)   ;;  %v4868_v34 = vld [vmem:[#allocation15_spill] sm:$0xff] (%p2554_p8) }
 0x520   : >> { %v2819_v13 = vsel %vm2818_vm3, %v2762_v63, %v2817_v26  ;;  %3440 = vpow2.f32 (%p2554_p8), %v3138_v33  ;;  %v3134_v22 = vld [vmem:[%s4707_s10] ss:$0 sm:$0xff] (%p2554_p8) }
 0x521   : >> { %v2795_v4 = vrot.slane %v2794_v35, 2  ;;  %v2802_v59 = vrot.slane %v2801_v27, 4  ;;  %v2788_v16 = vrot.slane %v2787_v11, 1  ;;  %v2821_v21 = vsel %vm2820_vm4, %v2771_v5, %v2819_v13  ;;  %3196 = vmatpush3.bf16.msra.mxu0 (%p2554_p8), %v3433_v30 }
 0x522   : >> { %v2823_v20 = vsel %vm2822_vm5, %v2780_v32, %v2821_v21  ;;  %3442 = vpow2.f32 (%p2554_p8), %v3136_v62  ;;  %3197 = vmatprep.subr.bf16.mxu0 (%p2554_p8), %v3434_v51  ;;  %v2846_v3 = vmul.f32 (%p2554_p8), %v3134_v22, %v4867_v52  ;;  %v2847_v37 = vmul.f32 (%p2554_p8), %v3134_v22, %v4868_v34 }
 0x523   : >> { %v2796_v28 = vadd.f32 %v2795_v4, %v2794_v35  ;;  %v2803_v14 = vadd.f32 %v2802_v59, %v2801_v27  ;;  %v2789_v29 = vadd.f32 %v2788_v16, %v2787_v11  ;;  %v4869_v11 = vld [vmem:[#allocation12_spill] sm:$0xff] (%p2554_p8)  ;;  %v2845_v44 = vmul.f32 (%p2554_p8), %v3134_v22, %v4870_v58 }
 0x524   : > { %v2844_v35 = vmul.f32 (%p2554_p8), %v3134_v22, %v4869_v11 }
 0x525   : >> { %v2797_v17 = vrot.slane %v2796_v28, 1  ;;  %v2804_v19 = vrot.slane %v2803_v14, 2  ;;  %v2825_v45 = vsel %vm2824_vm6, %v2789_v29, %v2823_v20  ;;  %3198 = vmatpush3.bf16.msra.mxu0 (%p2554_p8), %v3434_v51 }
 0x526   : > { %3199 = vmatprep.subr.bf16.mxu0 (%p2554_p8), %v3435_v53 }
 0x527   : >> { %v2805_v42 = vadd.f32 %v2804_v19, %v2803_v14  ;;  %v2798_v9 = vadd.f32 %v2797_v17, %v2796_v28  ;;  %v3437_v49 = vpop.eup (%p2554_p8), %3436 }
 0x528   : > { %v2866_v50 = vadd.f32 (%p2554_p8), 1.0, %v3437_v49 }
 0x529   : >> { %v2806_v10 = vrot.slane %v2805_v42, 1  ;;  %v2827_v56 = vsel %vm2826_vm7, %v2798_v9, %v2825_v45  ;;  %3200 = vmatpush3.bf16.msra.mxu0 (%p2554_p8), %v3435_v53 }
 0x52a   : > { %2556 = sbr.rel (!%p2554_p8) target bundleno = 1160 (0x488), region = 113  ;;  %3444 = vrcp.f32 (%p2554_p8), %v2866_v50 }
 0x52b   : >> { %v2807_v8 = vadd.f32 %v2806_v10, %v2805_v42  ;;  %v3439_v40 = vpop.eup (%p2554_p8), %3438 }
 0x52c   : > { %v2864_v31 = vadd.f32 (%p2554_p8), 1.0, %v3439_v40 }
 0x52d   : >> { %v2829_v43 = vsel %vm2828_vm8, %v2807_v8, %v2827_v56  ;;  %v3441_v41 = vpop.eup (%p2554_p8), %3440 }
 0x52e   : >> { %2832 = vst.msk [vmem:[%s2831_s30] sm:$0xff] %vm774_vm2, %v2829_v43  ;;  %v2867_v47 = vadd.f32 (%p2554_p8), 1.0, %v3441_v41  ;;  %3446 = vrcp.f32 (%p2554_p8), %v2864_v31 }
 0x52f   : > { %v3443_v46 = vpop.eup %3442 }
 0x530   : > { %v2865_v48 = vadd.f32 1.0, %v3443_v46  ;;  %3448 = vrcp.f32 %v2867_v47 }
 0x532   : > { %3450 = vrcp.f32 %v2865_v48 }
 0x535   : > { %v2835_v7 = vld [vmem:[#allocation7 + $0x10] sm:$0xff]  ;;  %v2836_v27 = vld [vmem:[#allocation7 + $0x18] sm:$0xff]  ;;  %v2833_v4 = vld [vmem:[#allocation7] sm:$0xff] }
 0x536   : > { %v2834_v59 = vld [vmem:[#allocation7 + $0x8] sm:$0xff]  ;;  %v2850_v15 = vadd.f32 %v2846_v3, %v2835_v7  ;;  %v2851_v16 = vadd.f32 %v2847_v37, %v2836_v27  ;;  %v2848_v28 = vadd.f32 %v2844_v35, %v2833_v4 }
 0x537   : > { %v3445_v55 = vpop.eup %3444  ;;  %v2849_v14 = vadd.f32 %v2845_v44, %v2834_v59 }
 0x538   : > { %v2878_v60 = vmul.f32 %v3445_v55, %v4863_v18 }
 0x53a   : > { %2888 = vrot.lane.b32.xlu1 %v2878_v60, %s3503_s22 }
 0x53b   : > { %v3447_v57 = vpop.eup %3446 }
 0x53c   : > { %v2876_v38 = vmul.f32 %v3447_v57, %v4864_v6 }
 0x53d   : > { %v3449_v0 = vpop.eup %3448 }
 0x53e   : > { %v2879_v25 = vmul.f32 %v3449_v0, %v4865_v1  ;;  %2884 = vrot.lane.b32.xlu0 %v2876_v38, %s3503_s22 }
 0x53f   : > { %v3451_v54 = vpop.eup %3450 }
 0x540   : > { %v2877_v24 = vmul.f32 %v3451_v54, %v4866_v36  ;;  %2890 = vrot.lane.b32.xlu1 %v2879_v25, %s3503_s22 }
 0x542   : > { %2886 = vrot.lane.b32.xlu0 %v2877_v24, %s3503_s22 }
 0x5ac   : > { %v2889_v12 = vpop.permute.xlu1 %2888 }
 0x5ad   : > { %v2898_v5 = vmul.f32 %v2889_v12, %v2850_v15 }
 0x5b0   : > { %v2885_v2 = vpop.permute.xlu0 %2884 }
 0x5b1   : > { %v2896_v32 = vmul.f32 %v2885_v2, %v2848_v28 }
 0x5b2   : > { %v2891_v63 = vpop.permute.xlu1 %2890 }
 0x5b3   : > { %v2899_v17 = vmul.f32 %v2891_v63, %v2851_v16 }
 0x5b4   : > { %v2887_v19 = vpop.permute.xlu0 %2886 }
 0x5b5   : > { %v2897_v26 = vmul.f32 %v2887_v19, %v2849_v14  ;;  %v2901_v29 = vpack.c.bf16 %v2899_v17, %v2898_v5 }
 0x5b7   : > { %v2900_v42 = vpack.c.bf16 %v2897_v26, %v2896_v32 }
 0x5b9   : > { %3201 = vmatprep.mubr.msk.bf16.mxu0 %vm774_vm2, %v2900_v42 }
 0x5ba   : > { %3202 = vmatmul.mubr.msk.bf16.vlgmr.msra.gmra.mxu0 %vm774_vm2, %v2901_v29 }
 0x67a   : > { %v3203_v13 = vpop.f32.mrf.mxu0 }
 0x67b   : > { %2991 = vst.msk [vmem:[%s3605_s19 + $0x10] sm:$0xff] %vm469_vm1, %v3203_v13 }
 0x67c   : > { %v2974_v9 = vpop.f32.mrf.mxu0 }
 0x67d   : > { %2989 = vst.msk [vmem:[%s3605_s19] sm:$0xff] %vm469_vm1, %v2974_v9 }
 0x67e   : > { %v3204_v21 = vpop.f32.mrf.mxu0 }
 0x67f   : > { %2992 = vst.msk [vmem:[%s3605_s19 + $0x18] sm:$0xff] %vm469_vm1, %v3204_v21 }
 0x680   : > { %v2977_v10 = vpop.f32.mrf.mxu0 }
 0x681   : > { %2990 = vst.msk [vmem:[%s3605_s19 + $0x8] sm:$0xff] %vm469_vm1, %v2977_v10 }
 0x682 PF: > { %s22_s25 = sadd.s32 1, %s3494_s25   ;;  %s4871_s21 = smov %s3486_s23 }
 0x683   : > { %p19_p9 = scmp.ge.s32.totalorder %s22_s25, 6   ;;  %s4872_s22 = smov %s3490_s24 }
 0x684   : > { %s4873_s23 = smov %s4876_s26  ;;  %s4874_s24 = smov %s4880_s27 }
 0x685   :  { %21 = sbr.rel (!%p19_p9) target bundleno = 3 (0x3), region = 124 }

</bundles_post_ra>
